<compile_context>
chip_gen: v7x
topology: tpu7x:2x2x1
jax: 0.10.0
libtpu: 0.0.40
codegen_flags: <defaults>
</compile_context>

<pallas_src>
import functools

import jax
import jax.numpy as jnp
import numpy as np
from jax.experimental import pallas as pl
from jax.experimental.pallas import tpu as pltpu

KSIZE = 7
PAD = 3
BN_EPS = 1e-5


def _shuffle_attention_kernel(x_ref, params_ref, wbig_ref, smix_ref, masks_ref,
                              out_ref, *, W, row_src):
    BC, L = x_ref.shape
    K2 = KSIZE * KSIZE
    x = x_ref[...]                                               # (BC, L) f32

    # ---- channel attention: GAP -> (permuted, block-diag) 1x1 conv -> sigmoid
    pooled = jnp.sum(x, axis=1, keepdims=True) * (1.0 / L)       # (BC, 1)
    logits = jnp.zeros((BC, 1), jnp.float32)
    for j in range(BC):                                          # tiny VPU matvec
        logits = logits + wbig_ref[:, j:j + 1] * pooled[j:j + 1, :]
    ca = jax.nn.sigmoid(logits)                                  # (BC, 1)

    # ---- depthwise 7x7 conv: lane rolls (XLU) + separable border masks -----
    # masks rows [0,7): pre-roll w-masks per kw; rows [7,14): post-roll h-masks
    # per kh.  Inner body per tap = 1 roll + 1 mul + 1 add; 7 independent
    # per-kh accumulator chains give the VALUs ILP.
    acc = [None] * KSIZE
    for kw in range(KSIZE):
        dw = kw - PAD
        xw = x * masks_ref[kw:kw + 1, :]                         # (BC, L)
        for kh in range(KSIZE):
            dh = kh - PAD
            shift = (-(dh * W + dw)) % L
            rolled = xw if shift == 0 else pltpu.roll(xw, shift=shift, axis=1)
            wk = params_ref[:, kh * KSIZE + kw:kh * KSIZE + kw + 1]   # (BC, 1)
            term = rolled * wk
            acc[kh] = term if kw == 0 else acc[kh] + term
    conv = acc[0] * masks_ref[KSIZE:KSIZE + 1, :]
    for kh in range(1, KSIZE):
        conv = conv + acc[kh] * masks_ref[KSIZE + kh:KSIZE + kh + 1, :]

    # ---- BatchNorm2d (training-mode batch stats) folded into scale/shift ---
    rsum = jnp.sum(conv, axis=1, keepdims=True)                  # (BC, 1)
    rsq = jnp.sum(conv * conv, axis=1, keepdims=True)            # (BC, 1)
    mean = jnp.zeros((BC, 1), jnp.float32)
    msq = jnp.zeros((BC, 1), jnp.float32)
    for j in range(BC):                                          # cross-batch mix
        sj = smix_ref[:, j:j + 1]                                # (BC, 1)
        mean = mean + sj * rsum[j:j + 1, :]
        msq = msq + sj * rsq[j:j + 1, :]
    var = jnp.maximum(msq - mean * mean, 0.0)                    # clamp (no NaN)
    gamma = params_ref[:, K2:K2 + 1]
    beta = params_ref[:, K2 + 1:K2 + 2]
    scale = gamma * jax.lax.rsqrt(var + BN_EPS)                  # (BC, 1)
    shift_c = beta - mean * scale                                # (BC, 1)
    sa = jax.nn.sigmoid(conv * scale + shift_c)                  # (BC, L)

    tmp = x * sa * ca                                            # (BC, L)
    # channel shuffle of the result rows: one sublane permute, then a dense
    # unmasked store (lane dim L = 256).
    out_ref[...] = jnp.concatenate([tmp[r:r + 1, :] for r in row_src], axis=0)


def shuffle_attention_forward(x_nchw, w_ca, w_dw, bn_gamma, bn_beta, groups=2):
    B, C, H, W = x_nchw.shape
    L = H * W
    BC = B * C
    K2 = KSIZE * KSIZE

    # channel-shuffle permutation: xs[:, n] = x[:, perm[n]]
    perm = np.array([(n % groups) * (C // groups) + (n // groups)
                     for n in range(C)], dtype=np.int64)
    inv_perm = np.argsort(perm)
    # final output row r = b*C + n takes the kernel's (unshuffled) row b*C+perm[n]
    row_src = tuple(int(b * C + perm[n]) for b in range(B) for n in range(C))

    # ---- free metadata reshape of the activation: (B,C,H,W) -> (B*C, L) ----
    x_slab = x_nchw.reshape(BC, L).astype(jnp.float32)

    # ---- tiny parameter packing (permuted so the kernel works in x's
    #      original channel order); lane-major layouts, one small block ------
    wdw_p = jnp.asarray(w_dw, jnp.float32).reshape(C, K2)[inv_perm]       # (C, 49)
    gamma_p = jnp.asarray(bn_gamma, jnp.float32)[inv_perm].reshape(C, 1)
    beta_p = jnp.asarray(bn_beta, jnp.float32)[inv_perm].reshape(C, 1)
    params = jnp.concatenate(
        [jnp.tile(wdw_p, (B, 1)),
         jnp.tile(gamma_p, (B, 1)),
         jnp.tile(beta_p, (B, 1))], axis=1)                               # (BC, 51)

    wca_p = jnp.asarray(w_ca, jnp.float32).reshape(C, C)[inv_perm][:, inv_perm]
    wbig = jnp.kron(jnp.eye(B, dtype=jnp.float32), wca_p)                 # (BC, BC)
    smix = jnp.asarray(
        np.kron(np.ones((B, B), np.float32), np.eye(C, dtype=np.float32))
        / float(B * L))                                                   # (BC, BC)

    # ---- border masks for the depthwise conv (host numpy constants) --------
    lane = np.arange(L)
    h_idx, w_idx = lane // W, lane % W
    masks_np = np.zeros((2 * KSIZE + 2, L), np.float32)   # pad rows to 16
    for kw in range(KSIZE):                               # pre-roll w masks
        dw = kw - PAD
        masks_np[kw] = ((w_idx - dw >= 0) & (w_idx - dw < W)).astype(np.float32)
    for kh in range(KSIZE):                               # post-roll h masks
        dh = kh - PAD
        masks_np[KSIZE + kh] = ((h_idx + dh >= 0) &
                                (h_idx + dh < H)).astype(np.float32)
    masks = jnp.asarray(masks_np)                                          # (16, L)

    kernel = functools.partial(_shuffle_attention_kernel, W=W, row_src=row_src)

    out_slab = pl.pallas_call(
        kernel,
        out_shape=jax.ShapeDtypeStruct((BC, L), jnp.float32),
        grid=(1,),
        in_specs=[
            pl.BlockSpec((BC, L), lambda i: (0, 0)),
            pl.BlockSpec((BC, K2 + 2), lambda i: (0, 0)),
            pl.BlockSpec((BC, BC), lambda i: (0, 0)),
            pl.BlockSpec((BC, BC), lambda i: (0, 0)),
            pl.BlockSpec((2 * KSIZE + 2, L), lambda i: (0, 0)),
        ],
        out_specs=pl.BlockSpec((BC, L), lambda i: (0, 0)),
        compiler_params=pltpu.CompilerParams(dimension_semantics=("arbitrary",)),
    )(x_slab, params, wbig, smix, masks)

    return out_slab.reshape(B, C, H, W)


def shuffle_attention_ref(x, w_ca, w_dw, gamma, beta, groups=2):
    """Pure-JAX reference mirroring the PyTorch forward (training-mode BN)."""
    B, C, H, W = x.shape
    xs = x.reshape(B, groups, C // groups, H, W)
    xs = jnp.transpose(xs, (0, 2, 1, 3, 4)).reshape(B, C, H, W)
    pooled = jnp.mean(xs, axis=(2, 3))                                 # (B, C)
    ca = jax.nn.sigmoid(jnp.einsum('bc,oc->bo', pooled, w_ca.reshape(C, C)))
    ca = ca[:, :, None, None]
    conv = jax.lax.conv_general_dilated(
        xs, w_dw, window_strides=(1, 1), padding=((PAD, PAD), (PAD, PAD)),
        feature_group_count=C, dimension_numbers=('NCHW', 'OIHW', 'NCHW'))
    mean = jnp.mean(conv, axis=(0, 2, 3), keepdims=True)
    var = jnp.mean((conv - mean) ** 2, axis=(0, 2, 3), keepdims=True)
    bn = (conv - mean) * jax.lax.rsqrt(var + BN_EPS) * gamma.reshape(1, C, 1, 1) \
         + beta.reshape(1, C, 1, 1)
    sa = jax.nn.sigmoid(bn)
    return xs * ca * sa


if __name__ == "__main__":
    key = jax.random.PRNGKey(0)
    k1, k2, k3, k4, k5 = jax.random.split(key, 5)
    B, C, H, W = 2, 4, 16, 16

    x = jax.random.normal(k1, (B, C, H, W), jnp.float32)
    # deterministic synthetic parameters (shapes per the module's __init__)
    w_ca = jax.random.normal(k2, (C, C, 1, 1), jnp.float32) * 0.1   # 1x1 conv, no bias
    w_dw = jax.random.normal(k3, (C, 1, 7, 7), jnp.float32) * 0.1   # depthwise 7x7, no bias
    gamma = 1.0 + 0.1 * jax.random.normal(k4, (C,), jnp.float32)    # BN affine weight
    beta = 0.1 * jax.random.normal(k5, (C,), jnp.float32)           # BN affine bias
    # TODO(synk): BatchNorm running-stat buffer updates (training side effect) are not
    # modeled; they do not affect the forward output in training mode.

    out = shuffle_attention_forward(x, w_ca, w_dw, gamma, beta)
    out = jax.block_until_ready(out)

    ref = shuffle_attention_ref(x, w_ca, w_dw, gamma, beta)
    np.testing.assert_allclose(np.asarray(out), np.asarray(ref), rtol=1e-4, atol=1e-5)
    print("KERNEL_OK")
</pallas_src>

<mosaic_0001>
module attributes {stable_mosaic.version = 11 : i64} {
  func.func @_shuffle_attention_kernel(%arg0: i32, %arg1: memref<8x256xf32, #tpu.memory_space<vmem>>, %arg2: memref<8x51xf32, #tpu.memory_space<vmem>>, %arg3: memref<8x8xf32, #tpu.memory_space<vmem>>, %arg4: memref<8x8xf32, #tpu.memory_space<vmem>>, %arg5: memref<16x256xf32, #tpu.memory_space<vmem>>, %arg6: memref<8x256xf32, #tpu.memory_space<vmem>>) attributes {dimension_semantics = [#tpu.dimension_semantics<arbitrary>], iteration_bounds = array<i64: 1>, scalar_prefetch = 0 : i64, scratch_operands = 0 : i64, tpu.core_type = #tpu.core_type<tc>, window_params = [{pipeline_mode = #tpu.pipeline_mode<synchronous>, transform_indices = @transform_0, window_bounds = array<i64: 8, 256>}, {pipeline_mode = #tpu.pipeline_mode<synchronous>, transform_indices = @transform_1, window_bounds = array<i64: 8, 51>}, {pipeline_mode = #tpu.pipeline_mode<synchronous>, transform_indices = @transform_2, window_bounds = array<i64: 8, 8>}, {pipeline_mode = #tpu.pipeline_mode<synchronous>, transform_indices = @transform_3, window_bounds = array<i64: 8, 8>}, {pipeline_mode = #tpu.pipeline_mode<synchronous>, transform_indices = @transform_4, window_bounds = array<i64: 16, 256>}, {pipeline_mode = #tpu.pipeline_mode<synchronous>, transform_indices = @transform_5, window_bounds = array<i64: 8, 256>}]} {
    %c0 = arith.constant 0 : index
    %c0_0 = arith.constant 0 : index
    %0 = vector.load %arg1[%c0, %c0_0] : memref<8x256xf32, #tpu.memory_space<vmem>>, vector<8x256xf32>
    %cst = arith.constant dense<0.000000e+00> : vector<8xf32>
    %1 = vector.multi_reduction <add>, %0, %cst [1] : vector<8x256xf32> to vector<8xf32>
    %2 = vector.shape_cast %1 : vector<8xf32> to vector<8x1xf32>
    %cst_1 = arith.constant 3.906250e-03 : f32
    %3 = vector.broadcast %cst_1 : f32 to vector<8x1xf32>
    %4 = arith.mulf %2, %3 : vector<8x1xf32>
    %cst_2 = arith.constant 0.000000e+00 : f32
    %5 = vector.broadcast %cst_2 : f32 to vector<8x1xf32>
    %c0_3 = arith.constant 0 : index
    %c0_4 = arith.constant 0 : index
    %6 = vector.load %arg3[%c0_3, %c0_4] : memref<8x8xf32, #tpu.memory_space<vmem>>, vector<8x1xf32>
    %7 = vector.extract_strided_slice %4 {offsets = [0, 0], sizes = [1, 1], strides = [1, 1]} : vector<8x1xf32> to vector<1x1xf32>
    %8 = vector.broadcast %7 : vector<1x1xf32> to vector<8x1xf32>
    %9 = arith.mulf %6, %8 : vector<8x1xf32>
    %10 = arith.addf %5, %9 : vector<8x1xf32>
    %c0_5 = arith.constant 0 : index
    %c1 = arith.constant 1 : index
    %11 = vector.load %arg3[%c0_5, %c1] : memref<8x8xf32, #tpu.memory_space<vmem>>, vector<8x1xf32>
    %12 = vector.extract_strided_slice %4 {offsets = [1, 0], sizes = [1, 1], strides = [1, 1]} : vector<8x1xf32> to vector<1x1xf32>
    %13 = vector.broadcast %12 : vector<1x1xf32> to vector<8x1xf32>
    %14 = arith.mulf %11, %13 : vector<8x1xf32>
    %15 = arith.addf %10, %14 : vector<8x1xf32>
    %c0_6 = arith.constant 0 : index
    %c2 = arith.constant 2 : index
    %16 = vector.load %arg3[%c0_6, %c2] : memref<8x8xf32, #tpu.memory_space<vmem>>, vector<8x1xf32>
    %17 = vector.extract_strided_slice %4 {offsets = [2, 0], sizes = [1, 1], strides = [1, 1]} : vector<8x1xf32> to vector<1x1xf32>
    %18 = vector.broadcast %17 : vector<1x1xf32> to vector<8x1xf32>
    %19 = arith.mulf %16, %18 : vector<8x1xf32>
    %20 = arith.addf %15, %19 : vector<8x1xf32>
    %c0_7 = arith.constant 0 : index
    %c3 = arith.constant 3 : index
    %21 = vector.load %arg3[%c0_7, %c3] : memref<8x8xf32, #tpu.memory_space<vmem>>, vector<8x1xf32>
    %22 = vector.extract_strided_slice %4 {offsets = [3, 0], sizes = [1, 1], strides = [1, 1]} : vector<8x1xf32> to vector<1x1xf32>
    %23 = vector.broadcast %22 : vector<1x1xf32> to vector<8x1xf32>
    %24 = arith.mulf %21, %23 : vector<8x1xf32>
    %25 = arith.addf %20, %24 : vector<8x1xf32>
    %c0_8 = arith.constant 0 : index
    %c4 = arith.constant 4 : index
    %26 = vector.load %arg3[%c0_8, %c4] : memref<8x8xf32, #tpu.memory_space<vmem>>, vector<8x1xf32>
    %27 = vector.extract_strided_slice %4 {offsets = [4, 0], sizes = [1, 1], strides = [1, 1]} : vector<8x1xf32> to vector<1x1xf32>
    %28 = vector.broadcast %27 : vector<1x1xf32> to vector<8x1xf32>
    %29 = arith.mulf %26, %28 : vector<8x1xf32>
    %30 = arith.addf %25, %29 : vector<8x1xf32>
    %c0_9 = arith.constant 0 : index
    %c5 = arith.constant 5 : index
    %31 = vector.load %arg3[%c0_9, %c5] : memref<8x8xf32, #tpu.memory_space<vmem>>, vector<8x1xf32>
    %32 = vector.extract_strided_slice %4 {offsets = [5, 0], sizes = [1, 1], strides = [1, 1]} : vector<8x1xf32> to vector<1x1xf32>
    %33 = vector.broadcast %32 : vector<1x1xf32> to vector<8x1xf32>
    %34 = arith.mulf %31, %33 : vector<8x1xf32>
    %35 = arith.addf %30, %34 : vector<8x1xf32>
    %c0_10 = arith.constant 0 : index
    %c6 = arith.constant 6 : index
    %36 = vector.load %arg3[%c0_10, %c6] : memref<8x8xf32, #tpu.memory_space<vmem>>, vector<8x1xf32>
    %37 = vector.extract_strided_slice %4 {offsets = [6, 0], sizes = [1, 1], strides = [1, 1]} : vector<8x1xf32> to vector<1x1xf32>
    %38 = vector.broadcast %37 : vector<1x1xf32> to vector<8x1xf32>
    %39 = arith.mulf %36, %38 : vector<8x1xf32>
    %40 = arith.addf %35, %39 : vector<8x1xf32>
    %c0_11 = arith.constant 0 : index
    %c7 = arith.constant 7 : index
    %41 = vector.load %arg3[%c0_11, %c7] : memref<8x8xf32, #tpu.memory_space<vmem>>, vector<8x1xf32>
    %42 = vector.extract_strided_slice %4 {offsets = [7, 0], sizes = [1, 1], strides = [1, 1]} : vector<8x1xf32> to vector<1x1xf32>
    %43 = vector.broadcast %42 : vector<1x1xf32> to vector<8x1xf32>
    %44 = arith.mulf %41, %43 : vector<8x1xf32>
    %45 = arith.addf %40, %44 : vector<8x1xf32>
    %46 = arith.negf %45 : vector<8x1xf32>
    %47 = math.exp %46 : vector<8x1xf32>
    %cst_12 = arith.constant 1.000000e+00 : f32
    %48 = vector.broadcast %cst_12 : f32 to vector<8x1xf32>
    %49 = arith.addf %48, %47 : vector<8x1xf32>
    %50 = arith.divf %48, %49 : vector<8x1xf32>
    %c0_13 = arith.constant 0 : index
    %c0_14 = arith.constant 0 : index
    %51 = vector.load %arg5[%c0_13, %c0_14] : memref<16x256xf32, #tpu.memory_space<vmem>>, vector<1x256xf32>
    %52 = vector.broadcast %51 : vector<1x256xf32> to vector<8x256xf32>
    %53 = arith.mulf %0, %52 : vector<8x256xf32>
    %c51_i32 = arith.constant 51 : i32
    %54 = tpu.dynamic_rotate %53 by %c51_i32 dim 1 : vector<8x256xf32>, i32 -> vector<8x256xf32>
    %c0_15 = arith.constant 0 : index
    %c0_16 = arith.constant 0 : index
    %55 = vector.load %arg2[%c0_15, %c0_16] : memref<8x51xf32, #tpu.memory_space<vmem>>, vector<8x1xf32>
    %56 = vector.broadcast %55 : vector<8x1xf32> to vector<8x256xf32>
    %57 = arith.mulf %54, %56 : vector<8x256xf32>
    %c35_i32 = arith.constant 35 : i32
    %58 = tpu.dynamic_rotate %53 by %c35_i32 dim 1 : vector<8x256xf32>, i32 -> vector<8x256xf32>
    %c0_17 = arith.constant 0 : index
    %c7_18 = arith.constant 7 : index
    %59 = vector.load %arg2[%c0_17, %c7_18] : memref<8x51xf32, #tpu.memory_space<vmem>>, vector<8x1xf32>
    %60 = vector.broadcast %59 : vector<8x1xf32> to vector<8x256xf32>
    %61 = arith.mulf %58, %60 : vector<8x256xf32>
    %c19_i32 = arith.constant 19 : i32
    %62 = tpu.dynamic_rotate %53 by %c19_i32 dim 1 : vector<8x256xf32>, i32 -> vector<8x256xf32>
    %c0_19 = arith.constant 0 : index
    %c14 = arith.constant 14 : index
    %63 = vector.load %arg2[%c0_19, %c14] : memref<8x51xf32, #tpu.memory_space<vmem>>, vector<8x1xf32>
    %64 = vector.broadcast %63 : vector<8x1xf32> to vector<8x256xf32>
    %65 = arith.mulf %62, %64 : vector<8x256xf32>
    %c3_i32 = arith.constant 3 : i32
    %66 = tpu.dynamic_rotate %53 by %c3_i32 dim 1 : vector<8x256xf32>, i32 -> vector<8x256xf32>
    %c0_20 = arith.constant 0 : index
    %c21 = arith.constant 21 : index
    %67 = vector.load %arg2[%c0_20, %c21] : memref<8x51xf32, #tpu.memory_space<vmem>>, vector<8x1xf32>
    %68 = vector.broadcast %67 : vector<8x1xf32> to vector<8x256xf32>
    %69 = arith.mulf %66, %68 : vector<8x256xf32>
    %c243_i32 = arith.constant 243 : i32
    %70 = tpu.dynamic_rotate %53 by %c243_i32 dim 1 : vector<8x256xf32>, i32 -> vector<8x256xf32>
    %c0_21 = arith.constant 0 : index
    %c28 = arith.constant 28 : index
    %71 = vector.load %arg2[%c0_21, %c28] : memref<8x51xf32, #tpu.memory_space<vmem>>, vector<8x1xf32>
    %72 = vector.broadcast %71 : vector<8x1xf32> to vector<8x256xf32>
    %73 = arith.mulf %70, %72 : vector<8x256xf32>
    %c227_i32 = arith.constant 227 : i32
    %74 = tpu.dynamic_rotate %53 by %c227_i32 dim 1 : vector<8x256xf32>, i32 -> vector<8x256xf32>
    %c0_22 = arith.constant 0 : index
    %c35 = arith.constant 35 : index
    %75 = vector.load %arg2[%c0_22, %c35] : memref<8x51xf32, #tpu.memory_space<vmem>>, vector<8x1xf32>
    %76 = vector.broadcast %75 : vector<8x1xf32> to vector<8x256xf32>
    %77 = arith.mulf %74, %76 : vector<8x256xf32>
    %c211_i32 = arith.constant 211 : i32
    %78 = tpu.dynamic_rotate %53 by %c211_i32 dim 1 : vector<8x256xf32>, i32 -> vector<8x256xf32>
    %c0_23 = arith.constant 0 : index
    %c42 = arith.constant 42 : index
    %79 = vector.load %arg2[%c0_23, %c42] : memref<8x51xf32, #tpu.memory_space<vmem>>, vector<8x1xf32>
    %80 = vector.broadcast %79 : vector<8x1xf32> to vector<8x256xf32>
    %81 = arith.mulf %78, %80 : vector<8x256xf32>
    %c1_24 = arith.constant 1 : index
    %c0_25 = arith.constant 0 : index
    %82 = vector.load %arg5[%c1_24, %c0_25] : memref<16x256xf32, #tpu.memory_space<vmem>>, vector<1x256xf32>
    %83 = vector.broadcast %82 : vector<1x256xf32> to vector<8x256xf32>
    %84 = arith.mulf %0, %83 : vector<8x256xf32>
    %c50_i32 = arith.constant 50 : i32
    %85 = tpu.dynamic_rotate %84 by %c50_i32 dim 1 : vector<8x256xf32>, i32 -> vector<8x256xf32>
    %c0_26 = arith.constant 0 : index
    %c1_27 = arith.constant 1 : index
    %86 = vector.load %arg2[%c0_26, %c1_27] : memref<8x51xf32, #tpu.memory_space<vmem>>, vector<8x1xf32>
    %87 = vector.broadcast %86 : vector<8x1xf32> to vector<8x256xf32>
    %88 = arith.mulf %85, %87 : vector<8x256xf32>
    %89 = arith.addf %57, %88 : vector<8x256xf32>
    %c34_i32 = arith.constant 34 : i32
    %90 = tpu.dynamic_rotate %84 by %c34_i32 dim 1 : vector<8x256xf32>, i32 -> vector<8x256xf32>
    %c0_28 = arith.constant 0 : index
    %c8 = arith.constant 8 : index
    %91 = vector.load %arg2[%c0_28, %c8] : memref<8x51xf32, #tpu.memory_space<vmem>>, vector<8x1xf32>
    %92 = vector.broadcast %91 : vector<8x1xf32> to vector<8x256xf32>
    %93 = arith.mulf %90, %92 : vector<8x256xf32>
    %94 = arith.addf %61, %93 : vector<8x256xf32>
    %c18_i32 = arith.constant 18 : i32
    %95 = tpu.dynamic_rotate %84 by %c18_i32 dim 1 : vector<8x256xf32>, i32 -> vector<8x256xf32>
    %c0_29 = arith.constant 0 : index
    %c15 = arith.constant 15 : index
    %96 = vector.load %arg2[%c0_29, %c15] : memref<8x51xf32, #tpu.memory_space<vmem>>, vector<8x1xf32>
    %97 = vector.broadcast %96 : vector<8x1xf32> to vector<8x256xf32>
    %98 = arith.mulf %95, %97 : vector<8x256xf32>
    %99 = arith.addf %65, %98 : vector<8x256xf32>
    %c2_i32 = arith.constant 2 : i32
    %100 = tpu.dynamic_rotate %84 by %c2_i32 dim 1 : vector<8x256xf32>, i32 -> vector<8x256xf32>
    %c0_30 = arith.constant 0 : index
    %c22 = arith.constant 22 : index
    %101 = vector.load %arg2[%c0_30, %c22] : memref<8x51xf32, #tpu.memory_space<vmem>>, vector<8x1xf32>
    %102 = vector.broadcast %101 : vector<8x1xf32> to vector<8x256xf32>
    %103 = arith.mulf %100, %102 : vector<8x256xf32>
    %104 = arith.addf %69, %103 : vector<8x256xf32>
    %c242_i32 = arith.constant 242 : i32
    %105 = tpu.dynamic_rotate %84 by %c242_i32 dim 1 : vector<8x256xf32>, i32 -> vector<8x256xf32>
    %c0_31 = arith.constant 0 : index
    %c29 = arith.constant 29 : index
    %106 = vector.load %arg2[%c0_31, %c29] : memref<8x51xf32, #tpu.memory_space<vmem>>, vector<8x1xf32>
    %107 = vector.broadcast %106 : vector<8x1xf32> to vector<8x256xf32>
    %108 = arith.mulf %105, %107 : vector<8x256xf32>
    %109 = arith.addf %73, %108 : vector<8x256xf32>
    %c226_i32 = arith.constant 226 : i32
    %110 = tpu.dynamic_rotate %84 by %c226_i32 dim 1 : vector<8x256xf32>, i32 -> vector<8x256xf32>
    %c0_32 = arith.constant 0 : index
    %c36 = arith.constant 36 : index
    %111 = vector.load %arg2[%c0_32, %c36] : memref<8x51xf32, #tpu.memory_space<vmem>>, vector<8x1xf32>
    %112 = vector.broadcast %111 : vector<8x1xf32> to vector<8x256xf32>
    %113 = arith.mulf %110, %112 : vector<8x256xf32>
    %114 = arith.addf %77, %113 : vector<8x256xf32>
    %c210_i32 = arith.constant 210 : i32
    %115 = tpu.dynamic_rotate %84 by %c210_i32 dim 1 : vector<8x256xf32>, i32 -> vector<8x256xf32>
    %c0_33 = arith.constant 0 : index
    %c43 = arith.constant 43 : index
    %116 = vector.load %arg2[%c0_33, %c43] : memref<8x51xf32, #tpu.memory_space<vmem>>, vector<8x1xf32>
    %117 = vector.broadcast %116 : vector<8x1xf32> to vector<8x256xf32>
    %118 = arith.mulf %115, %117 : vector<8x256xf32>
    %119 = arith.addf %81, %118 : vector<8x256xf32>
    %c2_34 = arith.constant 2 : index
    %c0_35 = arith.constant 0 : index
    %120 = vector.load %arg5[%c2_34, %c0_35] : memref<16x256xf32, #tpu.memory_space<vmem>>, vector<1x256xf32>
    %121 = vector.broadcast %120 : vector<1x256xf32> to vector<8x256xf32>
    %122 = arith.mulf %0, %121 : vector<8x256xf32>
    %c49_i32 = arith.constant 49 : i32
    %123 = tpu.dynamic_rotate %122 by %c49_i32 dim 1 : vector<8x256xf32>, i32 -> vector<8x256xf32>
    %c0_36 = arith.constant 0 : index
    %c2_37 = arith.constant 2 : index
    %124 = vector.load %arg2[%c0_36, %c2_37] : memref<8x51xf32, #tpu.memory_space<vmem>>, vector<8x1xf32>
    %125 = vector.broadcast %124 : vector<8x1xf32> to vector<8x256xf32>
    %126 = arith.mulf %123, %125 : vector<8x256xf32>
    %127 = arith.addf %89, %126 : vector<8x256xf32>
    %c33_i32 = arith.constant 33 : i32
    %128 = tpu.dynamic_rotate %122 by %c33_i32 dim 1 : vector<8x256xf32>, i32 -> vector<8x256xf32>
    %c0_38 = arith.constant 0 : index
    %c9 = arith.constant 9 : index
    %129 = vector.load %arg2[%c0_38, %c9] : memref<8x51xf32, #tpu.memory_space<vmem>>, vector<8x1xf32>
    %130 = vector.broadcast %129 : vector<8x1xf32> to vector<8x256xf32>
    %131 = arith.mulf %128, %130 : vector<8x256xf32>
    %132 = arith.addf %94, %131 : vector<8x256xf32>
    %c17_i32 = arith.constant 17 : i32
    %133 = tpu.dynamic_rotate %122 by %c17_i32 dim 1 : vector<8x256xf32>, i32 -> vector<8x256xf32>
    %c0_39 = arith.constant 0 : index
    %c16 = arith.constant 16 : index
    %134 = vector.load %arg2[%c0_39, %c16] : memref<8x51xf32, #tpu.memory_space<vmem>>, vector<8x1xf32>
    %135 = vector.broadcast %134 : vector<8x1xf32> to vector<8x256xf32>
    %136 = arith.mulf %133, %135 : vector<8x256xf32>
    %137 = arith.addf %99, %136 : vector<8x256xf32>
    %c1_i32 = arith.constant 1 : i32
    %138 = tpu.dynamic_rotate %122 by %c1_i32 dim 1 : vector<8x256xf32>, i32 -> vector<8x256xf32>
    %c0_40 = arith.constant 0 : index
    %c23 = arith.constant 23 : index
    %139 = vector.load %arg2[%c0_40, %c23] : memref<8x51xf32, #tpu.memory_space<vmem>>, vector<8x1xf32>
    %140 = vector.broadcast %139 : vector<8x1xf32> to vector<8x256xf32>
    %141 = arith.mulf %138, %140 : vector<8x256xf32>
    %142 = arith.addf %104, %141 : vector<8x256xf32>
    %c241_i32 = arith.constant 241 : i32
    %143 = tpu.dynamic_rotate %122 by %c241_i32 dim 1 : vector<8x256xf32>, i32 -> vector<8x256xf32>
    %c0_41 = arith.constant 0 : index
    %c30 = arith.constant 30 : index
    %144 = vector.load %arg2[%c0_41, %c30] : memref<8x51xf32, #tpu.memory_space<vmem>>, vector<8x1xf32>
    %145 = vector.broadcast %144 : vector<8x1xf32> to vector<8x256xf32>
    %146 = arith.mulf %143, %145 : vector<8x256xf32>
    %147 = arith.addf %109, %146 : vector<8x256xf32>
    %c225_i32 = arith.constant 225 : i32
    %148 = tpu.dynamic_rotate %122 by %c225_i32 dim 1 : vector<8x256xf32>, i32 -> vector<8x256xf32>
    %c0_42 = arith.constant 0 : index
    %c37 = arith.constant 37 : index
    %149 = vector.load %arg2[%c0_42, %c37] : memref<8x51xf32, #tpu.memory_space<vmem>>, vector<8x1xf32>
    %150 = vector.broadcast %149 : vector<8x1xf32> to vector<8x256xf32>
    %151 = arith.mulf %148, %150 : vector<8x256xf32>
    %152 = arith.addf %114, %151 : vector<8x256xf32>
    %c209_i32 = arith.constant 209 : i32
    %153 = tpu.dynamic_rotate %122 by %c209_i32 dim 1 : vector<8x256xf32>, i32 -> vector<8x256xf32>
    %c0_43 = arith.constant 0 : index
    %c44 = arith.constant 44 : index
    %154 = vector.load %arg2[%c0_43, %c44] : memref<8x51xf32, #tpu.memory_space<vmem>>, vector<8x1xf32>
    %155 = vector.broadcast %154 : vector<8x1xf32> to vector<8x256xf32>
    %156 = arith.mulf %153, %155 : vector<8x256xf32>
    %157 = arith.addf %119, %156 : vector<8x256xf32>
    %c3_44 = arith.constant 3 : index
    %c0_45 = arith.constant 0 : index
    %158 = vector.load %arg5[%c3_44, %c0_45] : memref<16x256xf32, #tpu.memory_space<vmem>>, vector<1x256xf32>
    %159 = vector.broadcast %158 : vector<1x256xf32> to vector<8x256xf32>
    %160 = arith.mulf %0, %159 : vector<8x256xf32>
    %c48_i32 = arith.constant 48 : i32
    %161 = tpu.dynamic_rotate %160 by %c48_i32 dim 1 : vector<8x256xf32>, i32 -> vector<8x256xf32>
    %c0_46 = arith.constant 0 : index
    %c3_47 = arith.constant 3 : index
    %162 = vector.load %arg2[%c0_46, %c3_47] : memref<8x51xf32, #tpu.memory_space<vmem>>, vector<8x1xf32>
    %163 = vector.broadcast %162 : vector<8x1xf32> to vector<8x256xf32>
    %164 = arith.mulf %161, %163 : vector<8x256xf32>
    %165 = arith.addf %127, %164 : vector<8x256xf32>
    %c32_i32 = arith.constant 32 : i32
    %166 = tpu.dynamic_rotate %160 by %c32_i32 dim 1 : vector<8x256xf32>, i32 -> vector<8x256xf32>
    %c0_48 = arith.constant 0 : index
    %c10 = arith.constant 10 : index
    %167 = vector.load %arg2[%c0_48, %c10] : memref<8x51xf32, #tpu.memory_space<vmem>>, vector<8x1xf32>
    %168 = vector.broadcast %167 : vector<8x1xf32> to vector<8x256xf32>
    %169 = arith.mulf %166, %168 : vector<8x256xf32>
    %170 = arith.addf %132, %169 : vector<8x256xf32>
    %c16_i32 = arith.constant 16 : i32
    %171 = tpu.dynamic_rotate %160 by %c16_i32 dim 1 : vector<8x256xf32>, i32 -> vector<8x256xf32>
    %c0_49 = arith.constant 0 : index
    %c17 = arith.constant 17 : index
    %172 = vector.load %arg2[%c0_49, %c17] : memref<8x51xf32, #tpu.memory_space<vmem>>, vector<8x1xf32>
    %173 = vector.broadcast %172 : vector<8x1xf32> to vector<8x256xf32>
    %174 = arith.mulf %171, %173 : vector<8x256xf32>
    %175 = arith.addf %137, %174 : vector<8x256xf32>
    %c0_50 = arith.constant 0 : index
    %c24 = arith.constant 24 : index
    %176 = vector.load %arg2[%c0_50, %c24] : memref<8x51xf32, #tpu.memory_space<vmem>>, vector<8x1xf32>
    %177 = vector.broadcast %176 : vector<8x1xf32> to vector<8x256xf32>
    %178 = arith.mulf %160, %177 : vector<8x256xf32>
    %179 = arith.addf %142, %178 : vector<8x256xf32>
    %c240_i32 = arith.constant 240 : i32
    %180 = tpu.dynamic_rotate %160 by %c240_i32 dim 1 : vector<8x256xf32>, i32 -> vector<8x256xf32>
    %c0_51 = arith.constant 0 : index
    %c31 = arith.constant 31 : index
    %181 = vector.load %arg2[%c0_51, %c31] : memref<8x51xf32, #tpu.memory_space<vmem>>, vector<8x1xf32>
    %182 = vector.broadcast %181 : vector<8x1xf32> to vector<8x256xf32>
    %183 = arith.mulf %180, %182 : vector<8x256xf32>
    %184 = arith.addf %147, %183 : vector<8x256xf32>
    %c224_i32 = arith.constant 224 : i32
    %185 = tpu.dynamic_rotate %160 by %c224_i32 dim 1 : vector<8x256xf32>, i32 -> vector<8x256xf32>
    %c0_52 = arith.constant 0 : index
    %c38 = arith.constant 38 : index
    %186 = vector.load %arg2[%c0_52, %c38] : memref<8x51xf32, #tpu.memory_space<vmem>>, vector<8x1xf32>
    %187 = vector.broadcast %186 : vector<8x1xf32> to vector<8x256xf32>
    %188 = arith.mulf %185, %187 : vector<8x256xf32>
    %189 = arith.addf %152, %188 : vector<8x256xf32>
    %c208_i32 = arith.constant 208 : i32
    %190 = tpu.dynamic_rotate %160 by %c208_i32 dim 1 : vector<8x256xf32>, i32 -> vector<8x256xf32>
    %c0_53 = arith.constant 0 : index
    %c45 = arith.constant 45 : index
    %191 = vector.load %arg2[%c0_53, %c45] : memref<8x51xf32, #tpu.memory_space<vmem>>, vector<8x1xf32>
    %192 = vector.broadcast %191 : vector<8x1xf32> to vector<8x256xf32>
    %193 = arith.mulf %190, %192 : vector<8x256xf32>
    %194 = arith.addf %157, %193 : vector<8x256xf32>
    %c4_54 = arith.constant 4 : index
    %c0_55 = arith.constant 0 : index
    %195 = vector.load %arg5[%c4_54, %c0_55] : memref<16x256xf32, #tpu.memory_space<vmem>>, vector<1x256xf32>
    %196 = vector.broadcast %195 : vector<1x256xf32> to vector<8x256xf32>
    %197 = arith.mulf %0, %196 : vector<8x256xf32>
    %c47_i32 = arith.constant 47 : i32
    %198 = tpu.dynamic_rotate %197 by %c47_i32 dim 1 : vector<8x256xf32>, i32 -> vector<8x256xf32>
    %c0_56 = arith.constant 0 : index
    %c4_57 = arith.constant 4 : index
    %199 = vector.load %arg2[%c0_56, %c4_57] : memref<8x51xf32, #tpu.memory_space<vmem>>, vector<8x1xf32>
    %200 = vector.broadcast %199 : vector<8x1xf32> to vector<8x256xf32>
    %201 = arith.mulf %198, %200 : vector<8x256xf32>
    %202 = arith.addf %165, %201 : vector<8x256xf32>
    %c31_i32 = arith.constant 31 : i32
    %203 = tpu.dynamic_rotate %197 by %c31_i32 dim 1 : vector<8x256xf32>, i32 -> vector<8x256xf32>
    %c0_58 = arith.constant 0 : index
    %c11 = arith.constant 11 : index
    %204 = vector.load %arg2[%c0_58, %c11] : memref<8x51xf32, #tpu.memory_space<vmem>>, vector<8x1xf32>
    %205 = vector.broadcast %204 : vector<8x1xf32> to vector<8x256xf32>
    %206 = arith.mulf %203, %205 : vector<8x256xf32>
    %207 = arith.addf %170, %206 : vector<8x256xf32>
    %c15_i32 = arith.constant 15 : i32
    %208 = tpu.dynamic_rotate %197 by %c15_i32 dim 1 : vector<8x256xf32>, i32 -> vector<8x256xf32>
    %c0_59 = arith.constant 0 : index
    %c18 = arith.constant 18 : index
    %209 = vector.load %arg2[%c0_59, %c18] : memref<8x51xf32, #tpu.memory_space<vmem>>, vector<8x1xf32>
    %210 = vector.broadcast %209 : vector<8x1xf32> to vector<8x256xf32>
    %211 = arith.mulf %208, %210 : vector<8x256xf32>
    %212 = arith.addf %175, %211 : vector<8x256xf32>
    %c255_i32 = arith.constant 255 : i32
    %213 = tpu.dynamic_rotate %197 by %c255_i32 dim 1 : vector<8x256xf32>, i32 -> vector<8x256xf32>
    %c0_60 = arith.constant 0 : index
    %c25 = arith.constant 25 : index
    %214 = vector.load %arg2[%c0_60, %c25] : memref<8x51xf32, #tpu.memory_space<vmem>>, vector<8x1xf32>
    %215 = vector.broadcast %214 : vector<8x1xf32> to vector<8x256xf32>
    %216 = arith.mulf %213, %215 : vector<8x256xf32>
    %217 = arith.addf %179, %216 : vector<8x256xf32>
    %c239_i32 = arith.constant 239 : i32
    %218 = tpu.dynamic_rotate %197 by %c239_i32 dim 1 : vector<8x256xf32>, i32 -> vector<8x256xf32>
    %c0_61 = arith.constant 0 : index
    %c32 = arith.constant 32 : index
    %219 = vector.load %arg2[%c0_61, %c32] : memref<8x51xf32, #tpu.memory_space<vmem>>, vector<8x1xf32>
    %220 = vector.broadcast %219 : vector<8x1xf32> to vector<8x256xf32>
    %221 = arith.mulf %218, %220 : vector<8x256xf32>
    %222 = arith.addf %184, %221 : vector<8x256xf32>
    %c223_i32 = arith.constant 223 : i32
    %223 = tpu.dynamic_rotate %197 by %c223_i32 dim 1 : vector<8x256xf32>, i32 -> vector<8x256xf32>
    %c0_62 = arith.constant 0 : index
    %c39 = arith.constant 39 : index
    %224 = vector.load %arg2[%c0_62, %c39] : memref<8x51xf32, #tpu.memory_space<vmem>>, vector<8x1xf32>
    %225 = vector.broadcast %224 : vector<8x1xf32> to vector<8x256xf32>
    %226 = arith.mulf %223, %225 : vector<8x256xf32>
    %227 = arith.addf %189, %226 : vector<8x256xf32>
    %c207_i32 = arith.constant 207 : i32
    %228 = tpu.dynamic_rotate %197 by %c207_i32 dim 1 : vector<8x256xf32>, i32 -> vector<8x256xf32>
    %c0_63 = arith.constant 0 : index
    %c46 = arith.constant 46 : index
    %229 = vector.load %arg2[%c0_63, %c46] : memref<8x51xf32, #tpu.memory_space<vmem>>, vector<8x1xf32>
    %230 = vector.broadcast %229 : vector<8x1xf32> to vector<8x256xf32>
    %231 = arith.mulf %228, %230 : vector<8x256xf32>
    %232 = arith.addf %194, %231 : vector<8x256xf32>
    %c5_64 = arith.constant 5 : index
    %c0_65 = arith.constant 0 : index
    %233 = vector.load %arg5[%c5_64, %c0_65] : memref<16x256xf32, #tpu.memory_space<vmem>>, vector<1x256xf32>
    %234 = vector.broadcast %233 : vector<1x256xf32> to vector<8x256xf32>
    %235 = arith.mulf %0, %234 : vector<8x256xf32>
    %c46_i32 = arith.constant 46 : i32
    %236 = tpu.dynamic_rotate %235 by %c46_i32 dim 1 : vector<8x256xf32>, i32 -> vector<8x256xf32>
    %c0_66 = arith.constant 0 : index
    %c5_67 = arith.constant 5 : index
    %237 = vector.load %arg2[%c0_66, %c5_67] : memref<8x51xf32, #tpu.memory_space<vmem>>, vector<8x1xf32>
    %238 = vector.broadcast %237 : vector<8x1xf32> to vector<8x256xf32>
    %239 = arith.mulf %236, %238 : vector<8x256xf32>
    %240 = arith.addf %202, %239 : vector<8x256xf32>
    %c30_i32 = arith.constant 30 : i32
    %241 = tpu.dynamic_rotate %235 by %c30_i32 dim 1 : vector<8x256xf32>, i32 -> vector<8x256xf32>
    %c0_68 = arith.constant 0 : index
    %c12 = arith.constant 12 : index
    %242 = vector.load %arg2[%c0_68, %c12] : memref<8x51xf32, #tpu.memory_space<vmem>>, vector<8x1xf32>
    %243 = vector.broadcast %242 : vector<8x1xf32> to vector<8x256xf32>
    %244 = arith.mulf %241, %243 : vector<8x256xf32>
    %245 = arith.addf %207, %244 : vector<8x256xf32>
    %c14_i32 = arith.constant 14 : i32
    %246 = tpu.dynamic_rotate %235 by %c14_i32 dim 1 : vector<8x256xf32>, i32 -> vector<8x256xf32>
    %c0_69 = arith.constant 0 : index
    %c19 = arith.constant 19 : index
    %247 = vector.load %arg2[%c0_69, %c19] : memref<8x51xf32, #tpu.memory_space<vmem>>, vector<8x1xf32>
    %248 = vector.broadcast %247 : vector<8x1xf32> to vector<8x256xf32>
    %249 = arith.mulf %246, %248 : vector<8x256xf32>
    %250 = arith.addf %212, %249 : vector<8x256xf32>
    %c254_i32 = arith.constant 254 : i32
    %251 = tpu.dynamic_rotate %235 by %c254_i32 dim 1 : vector<8x256xf32>, i32 -> vector<8x256xf32>
    %c0_70 = arith.constant 0 : index
    %c26 = arith.constant 26 : index
    %252 = vector.load %arg2[%c0_70, %c26] : memref<8x51xf32, #tpu.memory_space<vmem>>, vector<8x1xf32>
    %253 = vector.broadcast %252 : vector<8x1xf32> to vector<8x256xf32>
    %254 = arith.mulf %251, %253 : vector<8x256xf32>
    %255 = arith.addf %217, %254 : vector<8x256xf32>
    %c238_i32 = arith.constant 238 : i32
    %256 = tpu.dynamic_rotate %235 by %c238_i32 dim 1 : vector<8x256xf32>, i32 -> vector<8x256xf32>
    %c0_71 = arith.constant 0 : index
    %c33 = arith.constant 33 : index
    %257 = vector.load %arg2[%c0_71, %c33] : memref<8x51xf32, #tpu.memory_space<vmem>>, vector<8x1xf32>
    %258 = vector.broadcast %257 : vector<8x1xf32> to vector<8x256xf32>
    %259 = arith.mulf %256, %258 : vector<8x256xf32>
    %260 = arith.addf %222, %259 : vector<8x256xf32>
    %c222_i32 = arith.constant 222 : i32
    %261 = tpu.dynamic_rotate %235 by %c222_i32 dim 1 : vector<8x256xf32>, i32 -> vector<8x256xf32>
    %c0_72 = arith.constant 0 : index
    %c40 = arith.constant 40 : index
    %262 = vector.load %arg2[%c0_72, %c40] : memref<8x51xf32, #tpu.memory_space<vmem>>, vector<8x1xf32>
    %263 = vector.broadcast %262 : vector<8x1xf32> to vector<8x256xf32>
    %264 = arith.mulf %261, %263 : vector<8x256xf32>
    %265 = arith.addf %227, %264 : vector<8x256xf32>
    %c206_i32 = arith.constant 206 : i32
    %266 = tpu.dynamic_rotate %235 by %c206_i32 dim 1 : vector<8x256xf32>, i32 -> vector<8x256xf32>
    %c0_73 = arith.constant 0 : index
    %c47 = arith.constant 47 : index
    %267 = vector.load %arg2[%c0_73, %c47] : memref<8x51xf32, #tpu.memory_space<vmem>>, vector<8x1xf32>
    %268 = vector.broadcast %267 : vector<8x1xf32> to vector<8x256xf32>
    %269 = arith.mulf %266, %268 : vector<8x256xf32>
    %270 = arith.addf %232, %269 : vector<8x256xf32>
    %c6_74 = arith.constant 6 : index
    %c0_75 = arith.constant 0 : index
    %271 = vector.load %arg5[%c6_74, %c0_75] : memref<16x256xf32, #tpu.memory_space<vmem>>, vector<1x256xf32>
    %272 = vector.broadcast %271 : vector<1x256xf32> to vector<8x256xf32>
    %273 = arith.mulf %0, %272 : vector<8x256xf32>
    %c45_i32 = arith.constant 45 : i32
    %274 = tpu.dynamic_rotate %273 by %c45_i32 dim 1 : vector<8x256xf32>, i32 -> vector<8x256xf32>
    %c0_76 = arith.constant 0 : index
    %c6_77 = arith.constant 6 : index
    %275 = vector.load %arg2[%c0_76, %c6_77] : memref<8x51xf32, #tpu.memory_space<vmem>>, vector<8x1xf32>
    %276 = vector.broadcast %275 : vector<8x1xf32> to vector<8x256xf32>
    %277 = arith.mulf %274, %276 : vector<8x256xf32>
    %278 = arith.addf %240, %277 : vector<8x256xf32>
    %c29_i32 = arith.constant 29 : i32
    %279 = tpu.dynamic_rotate %273 by %c29_i32 dim 1 : vector<8x256xf32>, i32 -> vector<8x256xf32>
    %c0_78 = arith.constant 0 : index
    %c13 = arith.constant 13 : index
    %280 = vector.load %arg2[%c0_78, %c13] : memref<8x51xf32, #tpu.memory_space<vmem>>, vector<8x1xf32>
    %281 = vector.broadcast %280 : vector<8x1xf32> to vector<8x256xf32>
    %282 = arith.mulf %279, %281 : vector<8x256xf32>
    %283 = arith.addf %245, %282 : vector<8x256xf32>
    %c13_i32 = arith.constant 13 : i32
    %284 = tpu.dynamic_rotate %273 by %c13_i32 dim 1 : vector<8x256xf32>, i32 -> vector<8x256xf32>
    %c0_79 = arith.constant 0 : index
    %c20 = arith.constant 20 : index
    %285 = vector.load %arg2[%c0_79, %c20] : memref<8x51xf32, #tpu.memory_space<vmem>>, vector<8x1xf32>
    %286 = vector.broadcast %285 : vector<8x1xf32> to vector<8x256xf32>
    %287 = arith.mulf %284, %286 : vector<8x256xf32>
    %288 = arith.addf %250, %287 : vector<8x256xf32>
    %c253_i32 = arith.constant 253 : i32
    %289 = tpu.dynamic_rotate %273 by %c253_i32 dim 1 : vector<8x256xf32>, i32 -> vector<8x256xf32>
    %c0_80 = arith.constant 0 : index
    %c27 = arith.constant 27 : index
    %290 = vector.load %arg2[%c0_80, %c27] : memref<8x51xf32, #tpu.memory_space<vmem>>, vector<8x1xf32>
    %291 = vector.broadcast %290 : vector<8x1xf32> to vector<8x256xf32>
    %292 = arith.mulf %289, %291 : vector<8x256xf32>
    %293 = arith.addf %255, %292 : vector<8x256xf32>
    %c237_i32 = arith.constant 237 : i32
    %294 = tpu.dynamic_rotate %273 by %c237_i32 dim 1 : vector<8x256xf32>, i32 -> vector<8x256xf32>
    %c0_81 = arith.constant 0 : index
    %c34 = arith.constant 34 : index
    %295 = vector.load %arg2[%c0_81, %c34] : memref<8x51xf32, #tpu.memory_space<vmem>>, vector<8x1xf32>
    %296 = vector.broadcast %295 : vector<8x1xf32> to vector<8x256xf32>
    %297 = arith.mulf %294, %296 : vector<8x256xf32>
    %298 = arith.addf %260, %297 : vector<8x256xf32>
    %c221_i32 = arith.constant 221 : i32
    %299 = tpu.dynamic_rotate %273 by %c221_i32 dim 1 : vector<8x256xf32>, i32 -> vector<8x256xf32>
    %c0_82 = arith.constant 0 : index
    %c41 = arith.constant 41 : index
    %300 = vector.load %arg2[%c0_82, %c41] : memref<8x51xf32, #tpu.memory_space<vmem>>, vector<8x1xf32>
    %301 = vector.broadcast %300 : vector<8x1xf32> to vector<8x256xf32>
    %302 = arith.mulf %299, %301 : vector<8x256xf32>
    %303 = arith.addf %265, %302 : vector<8x256xf32>
    %c205_i32 = arith.constant 205 : i32
    %304 = tpu.dynamic_rotate %273 by %c205_i32 dim 1 : vector<8x256xf32>, i32 -> vector<8x256xf32>
    %c0_83 = arith.constant 0 : index
    %c48 = arith.constant 48 : index
    %305 = vector.load %arg2[%c0_83, %c48] : memref<8x51xf32, #tpu.memory_space<vmem>>, vector<8x1xf32>
    %306 = vector.broadcast %305 : vector<8x1xf32> to vector<8x256xf32>
    %307 = arith.mulf %304, %306 : vector<8x256xf32>
    %308 = arith.addf %270, %307 : vector<8x256xf32>
    %c7_84 = arith.constant 7 : index
    %c0_85 = arith.constant 0 : index
    %309 = vector.load %arg5[%c7_84, %c0_85] : memref<16x256xf32, #tpu.memory_space<vmem>>, vector<1x256xf32>
    %310 = vector.broadcast %309 : vector<1x256xf32> to vector<8x256xf32>
    %311 = arith.mulf %278, %310 : vector<8x256xf32>
    %c8_86 = arith.constant 8 : index
    %c0_87 = arith.constant 0 : index
    %312 = vector.load %arg5[%c8_86, %c0_87] : memref<16x256xf32, #tpu.memory_space<vmem>>, vector<1x256xf32>
    %313 = vector.broadcast %312 : vector<1x256xf32> to vector<8x256xf32>
    %314 = arith.mulf %283, %313 : vector<8x256xf32>
    %315 = arith.addf %311, %314 : vector<8x256xf32>
    %c9_88 = arith.constant 9 : index
    %c0_89 = arith.constant 0 : index
    %316 = vector.load %arg5[%c9_88, %c0_89] : memref<16x256xf32, #tpu.memory_space<vmem>>, vector<1x256xf32>
    %317 = vector.broadcast %316 : vector<1x256xf32> to vector<8x256xf32>
    %318 = arith.mulf %288, %317 : vector<8x256xf32>
    %319 = arith.addf %315, %318 : vector<8x256xf32>
    %c10_90 = arith.constant 10 : index
    %c0_91 = arith.constant 0 : index
    %320 = vector.load %arg5[%c10_90, %c0_91] : memref<16x256xf32, #tpu.memory_space<vmem>>, vector<1x256xf32>
    %321 = vector.broadcast %320 : vector<1x256xf32> to vector<8x256xf32>
    %322 = arith.mulf %293, %321 : vector<8x256xf32>
    %323 = arith.addf %319, %322 : vector<8x256xf32>
    %c11_92 = arith.constant 11 : index
    %c0_93 = arith.constant 0 : index
    %324 = vector.load %arg5[%c11_92, %c0_93] : memref<16x256xf32, #tpu.memory_space<vmem>>, vector<1x256xf32>
    %325 = vector.broadcast %324 : vector<1x256xf32> to vector<8x256xf32>
    %326 = arith.mulf %298, %325 : vector<8x256xf32>
    %327 = arith.addf %323, %326 : vector<8x256xf32>
    %c12_94 = arith.constant 12 : index
    %c0_95 = arith.constant 0 : index
    %328 = vector.load %arg5[%c12_94, %c0_95] : memref<16x256xf32, #tpu.memory_space<vmem>>, vector<1x256xf32>
    %329 = vector.broadcast %328 : vector<1x256xf32> to vector<8x256xf32>
    %330 = arith.mulf %303, %329 : vector<8x256xf32>
    %331 = arith.addf %327, %330 : vector<8x256xf32>
    %c13_96 = arith.constant 13 : index
    %c0_97 = arith.constant 0 : index
    %332 = vector.load %arg5[%c13_96, %c0_97] : memref<16x256xf32, #tpu.memory_space<vmem>>, vector<1x256xf32>
    %333 = vector.broadcast %332 : vector<1x256xf32> to vector<8x256xf32>
    %334 = arith.mulf %308, %333 : vector<8x256xf32>
    %335 = arith.addf %331, %334 : vector<8x256xf32>
    %cst_98 = arith.constant dense<0.000000e+00> : vector<8xf32>
    %336 = vector.multi_reduction <add>, %335, %cst_98 [1] : vector<8x256xf32> to vector<8xf32>
    %337 = vector.shape_cast %336 : vector<8xf32> to vector<8x1xf32>
    %338 = arith.mulf %335, %335 : vector<8x256xf32>
    %cst_99 = arith.constant dense<0.000000e+00> : vector<8xf32>
    %339 = vector.multi_reduction <add>, %338, %cst_99 [1] : vector<8x256xf32> to vector<8xf32>
    %340 = vector.shape_cast %339 : vector<8xf32> to vector<8x1xf32>
    %cst_100 = arith.constant 0.000000e+00 : f32
    %341 = vector.broadcast %cst_100 : f32 to vector<8x1xf32>
    %cst_101 = arith.constant 0.000000e+00 : f32
    %342 = vector.broadcast %cst_101 : f32 to vector<8x1xf32>
    %c0_102 = arith.constant 0 : index
    %c0_103 = arith.constant 0 : index
    %343 = vector.load %arg4[%c0_102, %c0_103] : memref<8x8xf32, #tpu.memory_space<vmem>>, vector<8x1xf32>
    %344 = vector.extract_strided_slice %337 {offsets = [0, 0], sizes = [1, 1], strides = [1, 1]} : vector<8x1xf32> to vector<1x1xf32>
    %345 = vector.broadcast %344 : vector<1x1xf32> to vector<8x1xf32>
    %346 = arith.mulf %343, %345 : vector<8x1xf32>
    %347 = arith.addf %341, %346 : vector<8x1xf32>
    %348 = vector.extract_strided_slice %340 {offsets = [0, 0], sizes = [1, 1], strides = [1, 1]} : vector<8x1xf32> to vector<1x1xf32>
    %349 = vector.broadcast %348 : vector<1x1xf32> to vector<8x1xf32>
    %350 = arith.mulf %343, %349 : vector<8x1xf32>
    %351 = arith.addf %342, %350 : vector<8x1xf32>
    %c0_104 = arith.constant 0 : index
    %c1_105 = arith.constant 1 : index
    %352 = vector.load %arg4[%c0_104, %c1_105] : memref<8x8xf32, #tpu.memory_space<vmem>>, vector<8x1xf32>
    %353 = vector.extract_strided_slice %337 {offsets = [1, 0], sizes = [1, 1], strides = [1, 1]} : vector<8x1xf32> to vector<1x1xf32>
    %354 = vector.broadcast %353 : vector<1x1xf32> to vector<8x1xf32>
    %355 = arith.mulf %352, %354 : vector<8x1xf32>
    %356 = arith.addf %347, %355 : vector<8x1xf32>
    %357 = vector.extract_strided_slice %340 {offsets = [1, 0], sizes = [1, 1], strides = [1, 1]} : vector<8x1xf32> to vector<1x1xf32>
    %358 = vector.broadcast %357 : vector<1x1xf32> to vector<8x1xf32>
    %359 = arith.mulf %352, %358 : vector<8x1xf32>
    %360 = arith.addf %351, %359 : vector<8x1xf32>
    %c0_106 = arith.constant 0 : index
    %c2_107 = arith.constant 2 : index
    %361 = vector.load %arg4[%c0_106, %c2_107] : memref<8x8xf32, #tpu.memory_space<vmem>>, vector<8x1xf32>
    %362 = vector.extract_strided_slice %337 {offsets = [2, 0], sizes = [1, 1], strides = [1, 1]} : vector<8x1xf32> to vector<1x1xf32>
    %363 = vector.broadcast %362 : vector<1x1xf32> to vector<8x1xf32>
    %364 = arith.mulf %361, %363 : vector<8x1xf32>
    %365 = arith.addf %356, %364 : vector<8x1xf32>
    %366 = vector.extract_strided_slice %340 {offsets = [2, 0], sizes = [1, 1], strides = [1, 1]} : vector<8x1xf32> to vector<1x1xf32>
    %367 = vector.broadcast %366 : vector<1x1xf32> to vector<8x1xf32>
    %368 = arith.mulf %361, %367 : vector<8x1xf32>
    %369 = arith.addf %360, %368 : vector<8x1xf32>
    %c0_108 = arith.constant 0 : index
    %c3_109 = arith.constant 3 : index
    %370 = vector.load %arg4[%c0_108, %c3_109] : memref<8x8xf32, #tpu.memory_space<vmem>>, vector<8x1xf32>
    %371 = vector.extract_strided_slice %337 {offsets = [3, 0], sizes = [1, 1], strides = [1, 1]} : vector<8x1xf32> to vector<1x1xf32>
    %372 = vector.broadcast %371 : vector<1x1xf32> to vector<8x1xf32>
    %373 = arith.mulf %370, %372 : vector<8x1xf32>
    %374 = arith.addf %365, %373 : vector<8x1xf32>
    %375 = vector.extract_strided_slice %340 {offsets = [3, 0], sizes = [1, 1], strides = [1, 1]} : vector<8x1xf32> to vector<1x1xf32>
    %376 = vector.broadcast %375 : vector<1x1xf32> to vector<8x1xf32>
    %377 = arith.mulf %370, %376 : vector<8x1xf32>
    %378 = arith.addf %369, %377 : vector<8x1xf32>
    %c0_110 = arith.constant 0 : index
    %c4_111 = arith.constant 4 : index
    %379 = vector.load %arg4[%c0_110, %c4_111] : memref<8x8xf32, #tpu.memory_space<vmem>>, vector<8x1xf32>
    %380 = vector.extract_strided_slice %337 {offsets = [4, 0], sizes = [1, 1], strides = [1, 1]} : vector<8x1xf32> to vector<1x1xf32>
    %381 = vector.broadcast %380 : vector<1x1xf32> to vector<8x1xf32>
    %382 = arith.mulf %379, %381 : vector<8x1xf32>
    %383 = arith.addf %374, %382 : vector<8x1xf32>
    %384 = vector.extract_strided_slice %340 {offsets = [4, 0], sizes = [1, 1], strides = [1, 1]} : vector<8x1xf32> to vector<1x1xf32>
    %385 = vector.broadcast %384 : vector<1x1xf32> to vector<8x1xf32>
    %386 = arith.mulf %379, %385 : vector<8x1xf32>
    %387 = arith.addf %378, %386 : vector<8x1xf32>
    %c0_112 = arith.constant 0 : index
    %c5_113 = arith.constant 5 : index
    %388 = vector.load %arg4[%c0_112, %c5_113] : memref<8x8xf32, #tpu.memory_space<vmem>>, vector<8x1xf32>
    %389 = vector.extract_strided_slice %337 {offsets = [5, 0], sizes = [1, 1], strides = [1, 1]} : vector<8x1xf32> to vector<1x1xf32>
    %390 = vector.broadcast %389 : vector<1x1xf32> to vector<8x1xf32>
    %391 = arith.mulf %388, %390 : vector<8x1xf32>
    %392 = arith.addf %383, %391 : vector<8x1xf32>
    %393 = vector.extract_strided_slice %340 {offsets = [5, 0], sizes = [1, 1], strides = [1, 1]} : vector<8x1xf32> to vector<1x1xf32>
    %394 = vector.broadcast %393 : vector<1x1xf32> to vector<8x1xf32>
    %395 = arith.mulf %388, %394 : vector<8x1xf32>
    %396 = arith.addf %387, %395 : vector<8x1xf32>
    %c0_114 = arith.constant 0 : index
    %c6_115 = arith.constant 6 : index
    %397 = vector.load %arg4[%c0_114, %c6_115] : memref<8x8xf32, #tpu.memory_space<vmem>>, vector<8x1xf32>
    %398 = vector.extract_strided_slice %337 {offsets = [6, 0], sizes = [1, 1], strides = [1, 1]} : vector<8x1xf32> to vector<1x1xf32>
    %399 = vector.broadcast %398 : vector<1x1xf32> to vector<8x1xf32>
    %400 = arith.mulf %397, %399 : vector<8x1xf32>
    %401 = arith.addf %392, %400 : vector<8x1xf32>
    %402 = vector.extract_strided_slice %340 {offsets = [6, 0], sizes = [1, 1], strides = [1, 1]} : vector<8x1xf32> to vector<1x1xf32>
    %403 = vector.broadcast %402 : vector<1x1xf32> to vector<8x1xf32>
    %404 = arith.mulf %397, %403 : vector<8x1xf32>
    %405 = arith.addf %396, %404 : vector<8x1xf32>
    %c0_116 = arith.constant 0 : index
    %c7_117 = arith.constant 7 : index
    %406 = vector.load %arg4[%c0_116, %c7_117] : memref<8x8xf32, #tpu.memory_space<vmem>>, vector<8x1xf32>
    %407 = vector.extract_strided_slice %337 {offsets = [7, 0], sizes = [1, 1], strides = [1, 1]} : vector<8x1xf32> to vector<1x1xf32>
    %408 = vector.broadcast %407 : vector<1x1xf32> to vector<8x1xf32>
    %409 = arith.mulf %406, %408 : vector<8x1xf32>
    %410 = arith.addf %401, %409 : vector<8x1xf32>
    %411 = vector.extract_strided_slice %340 {offsets = [7, 0], sizes = [1, 1], strides = [1, 1]} : vector<8x1xf32> to vector<1x1xf32>
    %412 = vector.broadcast %411 : vector<1x1xf32> to vector<8x1xf32>
    %413 = arith.mulf %406, %412 : vector<8x1xf32>
    %414 = arith.addf %405, %413 : vector<8x1xf32>
    %415 = arith.mulf %410, %410 : vector<8x1xf32>
    %416 = arith.subf %414, %415 : vector<8x1xf32>
    %cst_118 = arith.constant 0.000000e+00 : f32
    %417 = vector.broadcast %cst_118 : f32 to vector<8x1xf32>
    %418 = arith.maximumf %416, %417 : vector<8x1xf32>
    %c0_119 = arith.constant 0 : index
    %c49 = arith.constant 49 : index
    %419 = vector.load %arg2[%c0_119, %c49] : memref<8x51xf32, #tpu.memory_space<vmem>>, vector<8x1xf32>
    %c0_120 = arith.constant 0 : index
    %c50 = arith.constant 50 : index
    %420 = vector.load %arg2[%c0_120, %c50] : memref<8x51xf32, #tpu.memory_space<vmem>>, vector<8x1xf32>
    %cst_121 = arith.constant 9.99999974E-6 : f32
    %421 = vector.broadcast %cst_121 : f32 to vector<8x1xf32>
    %422 = arith.addf %418, %421 : vector<8x1xf32>
    %423 = math.rsqrt %422 : vector<8x1xf32>
    %424 = arith.mulf %419, %423 : vector<8x1xf32>
    %425 = arith.mulf %410, %424 : vector<8x1xf32>
    %426 = arith.subf %420, %425 : vector<8x1xf32>
    %427 = vector.broadcast %424 : vector<8x1xf32> to vector<8x256xf32>
    %428 = arith.mulf %335, %427 : vector<8x256xf32>
    %429 = vector.broadcast %426 : vector<8x1xf32> to vector<8x256xf32>
    %430 = arith.addf %428, %429 : vector<8x256xf32>
    %431 = arith.negf %430 : vector<8x256xf32>
    %432 = math.exp %431 : vector<8x256xf32>
    %cst_122 = arith.constant 1.000000e+00 : f32
    %433 = vector.broadcast %cst_122 : f32 to vector<8x256xf32>
    %434 = arith.addf %433, %432 : vector<8x256xf32>
    %435 = arith.divf %433, %434 : vector<8x256xf32>
    %436 = arith.mulf %0, %435 : vector<8x256xf32>
    %437 = vector.broadcast %50 : vector<8x1xf32> to vector<8x256xf32>
    %438 = arith.mulf %436, %437 : vector<8x256xf32>
    %439 = vector.extract_strided_slice %438 {offsets = [0, 0], sizes = [1, 256], strides = [1, 1]} : vector<8x256xf32> to vector<1x256xf32>
    %440 = vector.extract_strided_slice %438 {offsets = [2, 0], sizes = [1, 256], strides = [1, 1]} : vector<8x256xf32> to vector<1x256xf32>
    %441 = vector.extract_strided_slice %438 {offsets = [1, 0], sizes = [1, 256], strides = [1, 1]} : vector<8x256xf32> to vector<1x256xf32>
    %442 = vector.extract_strided_slice %438 {offsets = [3, 0], sizes = [1, 256], strides = [1, 1]} : vector<8x256xf32> to vector<1x256xf32>
    %443 = vector.extract_strided_slice %438 {offsets = [4, 0], sizes = [1, 256], strides = [1, 1]} : vector<8x256xf32> to vector<1x256xf32>
    %444 = vector.extract_strided_slice %438 {offsets = [6, 0], sizes = [1, 256], strides = [1, 1]} : vector<8x256xf32> to vector<1x256xf32>
    %445 = vector.extract_strided_slice %438 {offsets = [5, 0], sizes = [1, 256], strides = [1, 1]} : vector<8x256xf32> to vector<1x256xf32>
    %446 = vector.extract_strided_slice %438 {offsets = [7, 0], sizes = [1, 256], strides = [1, 1]} : vector<8x256xf32> to vector<1x256xf32>
    %447 = tpu.concatenate %439, %440, %441, %442, %443, %444, %445, %446 in 0 : vector<1x256xf32>, vector<1x256xf32>, vector<1x256xf32>, vector<1x256xf32>, vector<1x256xf32>, vector<1x256xf32>, vector<1x256xf32>, vector<1x256xf32> -> vector<8x256xf32>
    %c0_123 = arith.constant 0 : index
    %c0_124 = arith.constant 0 : index
    %448 = vector.load %arg6[%c0_123, %c0_124] : memref<8x256xf32, #tpu.memory_space<vmem>>, vector<8x256xf32>
    tpu.vector_store %arg6[%c0_123, %c0_124], %447 {strides = array<i32>} : memref<8x256xf32, #tpu.memory_space<vmem>>, vector<8x256xf32>,
    return
  }
  func.func @transform_0(%arg0: i32) -> (i32, i32) {
    %c0_i32 = arith.constant 0 : i32
    %c0_i32_0 = arith.constant 0 : i32
    %c0_i32_1 = arith.constant 0 : i32
    return %c0_i32, %c0_i32_0 : i32, i32
  }
  func.func @transform_1(%arg0: i32) -> (i32, i32) {
    %c0_i32 = arith.constant 0 : i32
    %c0_i32_0 = arith.constant 0 : i32
    %c0_i32_1 = arith.constant 0 : i32
    return %c0_i32, %c0_i32_0 : i32, i32
  }
  func.func @transform_2(%arg0: i32) -> (i32, i32) {
    %c0_i32 = arith.constant 0 : i32
    %c0_i32_0 = arith.constant 0 : i32
    %c0_i32_1 = arith.constant 0 : i32
    return %c0_i32, %c0_i32_0 : i32, i32
  }
  func.func @transform_3(%arg0: i32) -> (i32, i32) {
    %c0_i32 = arith.constant 0 : i32
    %c0_i32_0 = arith.constant 0 : i32
    %c0_i32_1 = arith.constant 0 : i32
    return %c0_i32, %c0_i32_0 : i32, i32
  }
  func.func @transform_4(%arg0: i32) -> (i32, i32) {
    %c0_i32 = arith.constant 0 : i32
    %c0_i32_0 = arith.constant 0 : i32
    %c0_i32_1 = arith.constant 0 : i32
    return %c0_i32, %c0_i32_0 : i32, i32
  }
  func.func @transform_5(%arg0: i32) -> (i32, i32) {
    %c0_i32 = arith.constant 0 : i32
    %c0_i32_0 = arith.constant 0 : i32
    %c0_i32_1 = arith.constant 0 : i32
    return %c0_i32, %c0_i32_0 : i32, i32
  }
}

</mosaic_0001>

<bundles_post_ra>
// kernel: tpu_custom_call.1
= control target key start
LH: loop header
LB: loop body
LE: loop exit
PB: predicated region body
PF: predicated region fallthrough
CT: control target
= control target key end

     0   :  { %10 = vsyncpa [#allocation3], 0  ;;  %s2851_s0 = inlined_call_operand.hbm [shape: f32[8,256], index: 0, kind: input, shape index: {}]   ;;  %s2852_s1 = inlined_call_operand.hbm [shape: f32[8,51], index: 1, kind: input, shape index: {}]   ;;  %s2853_s2 = inlined_call_operand.hbm [shape: f32[8,8], index: 2, kind: input, shape index: {}]   ;;  %s2854_s3 = inlined_call_operand.vmem [shape: f32[8,8], index: 3, kind: input, shape index: {}]   ;;  %s2855_s4 = inlined_call_operand.hbm [shape: f32[16,256], index: 4, kind: input, shape index: {}]   ;;  %s2856_s5 = inlined_call_operand.hbm [shape: f32[8,256], index: 5, kind: output, shape index: {}]  }
   0x1   :  { %11 = vsyncpa [#allocation6], 0 }
   0x2   :  { %12 = vsyncpa [#allocation9], 0 }
   0x3   :  { %13 = vsyncpa [#allocation4], 0  ;;  %s1662_s18 = smov [#allocation5]   ;;  %s1663_s20 = smov [#allocation2]  }
   0x4   :  { %s30_s19 = sshll.u32 %s1662_s18, 4  ;;  %s20_s21 = sshll.u32 %s1663_s20, 4  ;;  %s31_s19 = int_to_ptr.vmem [resolvable:$true] %s30_s19  ;;  %s21_s21 = int_to_ptr.vmem [resolvable:$true] %s20_s21 }
   0x5   :  { %s1544_s24 = scalar_lea.hbm %s2852_s1, 128 }
   0x6   :  { %p1545_p0 = scmp.ne.s32.totalorder %s2852_s1, %s1544_s24  ;;  %p1548_p1 = scmp.lt.u32.totalorder %s1544_s24, %s2852_s1 }
   0x8   :  { %p1550_p2 = pnand %p1548_p1, %p1545_p0 }
   0xa   :  { %1553 = shalt.err (!%p1550_p2)
}
   0xb   :  { %s1554_s29 = scalar_lea.vmem %s31_s19, 128  ;;  %p1559_p4 = scmp.lt.s32.totalorder %s31_s19, %s31_s19 }
   0xc   :  { %p1555_p3 = scmp.ne.s32.totalorder %s31_s19, %s1554_s29  ;;  %p1560_p5 = scmp.lt.s32.totalorder %s1554_s29, %s1554_s29 }
   0xe   :  { %p1561_p6 = por %p1560_p5, %p1559_p4 }
  0x10   :  { %p1562_p7 = pnand %p1561_p6, %p1555_p3 }
  0x12   :  { %1565 = shalt.err (!%p1562_p7)
}
  0x13   :  { %33 = dma.hbm_to_vmem [thread:$0]  %s2852_s1, 128, %s31_s19, [#allocation6]  }
  0x14   :  { %s1566_s9 = scalar_lea.hbm %s2851_s0, 256 }
  0x15   :  { %p1567_p8 = scmp.ne.s32.totalorder %s2851_s0, %s1566_s9  ;;  %p1570_p9 = scmp.lt.u32.totalorder %s1566_s9, %s2851_s0 }
  0x17   :  { %p1572_p10 = pnand %p1570_p9, %p1567_p8 }
  0x19   :  { %1575 = shalt.err (!%p1572_p10)
}
  0x1a   :  { %s1576_s14 = scalar_lea.vmem %s21_s21, 256  ;;  %p1581_p12 = scmp.lt.s32.totalorder %s21_s21, %s21_s21 }
  0x1b   :  { %p1577_p11 = scmp.ne.s32.totalorder %s21_s21, %s1576_s14  ;;  %p1582_p13 = scmp.lt.s32.totalorder %s1576_s14, %s1576_s14 }
  0x1d   :  { %p1583_p0 = por %p1582_p13, %p1581_p12 }
  0x1f   :  { %p1584_p1 = pnand %p1583_p0, %p1577_p11 }
  0x21   :  { %1587 = shalt.err (!%p1584_p1)
}
  0x22   :  { %23 = dma.hbm_to_vmem [thread:$0]  %s2851_s0, 256, %s21_s21, [#allocation3]  }
  0x23   :  { %s1664_s16 = smov [#allocation7]   ;;  %s1665_s18 = smov [#allocation8]  }
  0x24   :  { %s40_s17 = sshll.u32 %s1664_s16, 4  ;;  %s51_s19 = sshll.u32 %s1665_s18, 4  ;;  %s41_s17 = int_to_ptr.vmem [resolvable:$true] %s40_s17  ;;  %s1825_s19 = int_to_ptr.vmem [resolvable:$true] %s51_s19 }
  0x25   :  { %s1588_s23 = scalar_lea.hbm %s2853_s2, 128 }
  0x26   :  { %p1589_p2 = scmp.ne.s32.totalorder %s2853_s2, %s1588_s23  ;;  %p1592_p3 = scmp.lt.u32.totalorder %s1588_s23, %s2853_s2 }
  0x28   :  { %p1594_p4 = pnand %p1592_p3, %p1589_p2 }
  0x2a   :  { %1597 = shalt.err (!%p1594_p4)
}
  0x2b   :  { %s1598_s0 = scalar_lea.vmem %s41_s17, 128  ;;  %p1603_p6 = scmp.lt.s32.totalorder %s41_s17, %s41_s17 }
  0x2c   :  { %p1599_p5 = scmp.ne.s32.totalorder %s41_s17, %s1598_s0  ;;  %p1604_p7 = scmp.lt.s32.totalorder %s1598_s0, %s1598_s0 }
  0x2e   :  { %p1605_p8 = por %p1604_p7, %p1603_p6 }
  0x30   :  { %p1606_p9 = pnand %p1605_p8, %p1599_p5 }
  0x32   :  { %1609 = shalt.err (!%p1606_p9)
}
  0x33   :  { %43 = dma.hbm_to_vmem [thread:$0]  %s2853_s2, 128, %s41_s17, [#allocation6]  }
  0x34   :  { %s1610_s6 = scalar_lea.hbm %s2855_s4, 512 }
  0x35   :  { %p1611_p10 = scmp.ne.s32.totalorder %s2855_s4, %s1610_s6  ;;  %p1614_p11 = scmp.lt.u32.totalorder %s1610_s6, %s2855_s4 }
  0x37   :  { %p1616_p12 = pnand %p1614_p11, %p1611_p10 }
  0x39   :  { %1619 = shalt.err (!%p1616_p12)
}
  0x3a   :  { %s1620_s11 = scalar_lea.vmem %s1825_s19, 512  ;;  %p1625_p0 = scmp.lt.s32.totalorder %s1825_s19, %s1825_s19 }
  0x3b   :  { %p1621_p13 = scmp.ne.s32.totalorder %s1825_s19, %s1620_s11  ;;  %p1626_p1 = scmp.lt.s32.totalorder %s1620_s11, %s1620_s11 }
  0x3d   :  { %p1627_p2 = por %p1626_p1, %p1625_p0 }
  0x3f   :  { %p1628_p3 = pnand %p1627_p2, %p1621_p13 }
  0x41   :  { %1631 = shalt.err (!%p1628_p3)
}
  0x42   :  { %s1666_s2 = smov 256   ;;  %s1667_s12 = smov 16  }
  0x43   :  { %57 = dma.hbm_to_vmem [thread:$0]  %s2855_s4, 512, %s1825_s19, [#allocation9], %s1666_s2, %s1666_s2, %s1667_s12  }
  0x44   :  { %1654 = dma.done.wait [#allocation3], 256  }
  0x45   :  { %1655 = vsyncadd [#allocation3], 4294967040 }
  0x46   :  { %1656 = dma.done.wait [#allocation6], 256  }
  0x47   :  { %1657 = vsyncadd [#allocation6], 4294967040 }
  0x48   :  { %1658 = dma.done.wait [#allocation9], 512  }
  0x49   :  { %1659 = vsyncadd [#allocation9], 4294966784  ;;  %v1668_v0 = vmov 1   ;;  %v2857_v1 = vmov 0   ;;  %v1858_v2 = vld [vmem:[#allocation5] sm:$0xff]  ;;  %v1670_v3 = vmov 8   ;;  %v2858_v5 = vlaneseq }
  0x4a   :  { %1477 = vset.pattern.permute.xlu1 %v1668_v0  ;;  %1475 = vset.pattern.permute.xlu0 %v2857_v1  ;;  %v1671_v4 = vmov 7   ;;  %v1672_v6 = vmov 14   ;;  %v1673_v7 = vmov 15   ;;  %v1674_v10 = vmov 2   ;;  %v1875_v14 = vld [vmem:[#allocation2 + $0x8] sm:$0xff]  ;;  %s1679_s4 = smov 51  }
  0x4b   :  { %291 = vperm.xlu1 %1477, %v1858_v2   ;;  %185 = vperm.xlu0 %1475, %v1858_v2   ;;  %v1867_v8 = vshrl.u32 %v2858_v5, 7  ;;  %v1675_v11 = vmov 21   ;;  %v159_v12 = vld [vmem:[#allocation8] ss:$8 sm:$0x3]  ;;  %v1676_v15 = vmov 9  }
  0x4c   :  { %v1677_v16 = vmov 3   ;;  %v269_v19 = vld [vmem:[#allocation8 + $0x1] ss:$8 sm:$0x3]  ;;  %v1678_v20 = vmov 22   ;;  %v1680_v22 = vmov 29  }
  0x4d   :  { %2895 = vst [vmem:[#allocation15_spill] sm:$0xff] %v1867_v8  ;;  %v1870_v9 = vsub.s32 1, %v1867_v8  ;;  %v1883_v18 = vsub.s32 0, %v1867_v8  ;;  %v1888_v23 = vld [vmem:[#allocation2] sm:$0xff]  ;;  %s1681_s1 = smov 35   ;;  %v1682_v25 = vmov 16  }
  0x4e   :  { %s1683_s15 = smov 50   ;;  %v1684_v27 = vmov 10   ;;  %s1685_s16 = smov 34   ;;  %v1686_v29 = vmov 28   ;;  %v1687_v31 = vmov 4   ;;  %v1689_v33 = vmov 36  }
  0x4f   :  { %1478 = vset.pattern.permute.xlu1 %v1670_v3  ;;  %1476 = vset.pattern.permute.xlu0 %v1671_v4  ;;  %2896 = vst [vmem:[#allocation16_spill] sm:$0xff] %v1870_v9  ;;  %v168_v13 = vrot.slane %v159_v12, %v1870_v9  ;;  %2897 = vst [vmem:[#allocation17_spill] sm:$0xff] %v1883_v18  ;;  %v274_v21 = vrot.slane %v269_v19, %v1883_v18  ;;  %s1688_s17 = smov 19   ;;  %v1690_v34 = vmov 23   ;;  %s1691_s18 = smov 18   ;;  %v1693_v38 = vmov 30  }
  0x50   :  { %306 = vperm.xlu1 %1478, %v1858_v2   ;;  %198 = vperm.xlu0 %1476, %v1858_v2   ;;  %v164_v26 = vrot.slane %v159_v12, %v1883_v18  ;;  %v278_v30 = vrot.slane %v269_v19, %v1870_v9  ;;  %v389_v35 = vld [vmem:[#allocation8 + $0x2] ss:$8 sm:$0x3]  ;;  %s1692_s19 = smov 33   ;;  %v1694_v39 = vmov 17   ;;  %v1695_v40 = vmov 11  }
  0x51   :  { %v1880_v17 = vmul.f32 %v168_v13, %v1875_v14  ;;  %v1892_v24 = vmul.f32 %v274_v21, %v1888_v23  ;;  %v394_v36 = vrot.slane %v389_v35, %v1883_v18  ;;  %v1696_v41 = vmov 5   ;;  %s1698_s20 = smov 3   ;;  %s1700_s22 = smov 2   ;;  %v509_v46 = vld [vmem:[#allocation8 + $0x3] ss:$8 sm:$0x3] }
  0x52   :  { %v1900_v28 = vmul.f32 %v164_v26, %v1888_v23  ;;  %v1910_v32 = vmul.f32 %v278_v30, %v1875_v14  ;;  %v1697_v42 = vmov 35   ;;  %v1699_v43 = vmov 43   ;;  %s1702_s23 = smov 49   ;;  %s1704_s24 = smov 32  }
  0x53   :  { %v1922_v37 = vmul.f32 %v394_v36, %v1888_v23  ;;  %v398_v44 = vrot.slane %v389_v35, %v1870_v9  ;;  %v1701_v45 = vmov 24   ;;  %v514_v48 = vrot.slane %v509_v46, %v1883_v18  ;;  %s1708_s25 = smov 115   ;;  %s1711_s26 = smov 114   ;;  %v1970_v57 = vld [vmem:[#allocation8 + $0x4] ss:$8 sm:$0x3] }
  0x54   :  { %1479 = vset.pattern.permute.xlu1 %v1672_v6  ;;  %1480 = vset.pattern.permute.xlu0 %v1673_v7  ;;  %v1703_v49 = vmov 37   ;;  %v1705_v51 = vmov 31   ;;  %v1706_v52 = vmov 6   ;;  %v1707_v53 = vmov 18   ;;  %s1713_s27 = smov 1   ;;  %s1715_s0 = smov 17  }
  0x55   :  { %211 = vperm.xlu1 %1479, %v1858_v2   ;;  %321 = vperm.xlu0 %1480, %v1858_v2   ;;  %v1943_v47 = vmul.f32 %v398_v44, %v1875_v14  ;;  %v1950_v50 = vmul.f32 %v514_v48, %v1888_v23  ;;  %v1709_v54 = vmov 38   ;;  %v1710_v55 = vmov 12   ;;  %s1716_s21 = smov 31   ;;  %s1718_s28 = smov 48  }
  0x56   :  { %v1712_v56 = vmov 42   ;;  %v627_v58 = vrot.slane %v1970_v57, %v1883_v18  ;;  %v1714_v59 = vmov 25   ;;  %v1717_v61 = vmov 32   ;;  %s1719_s29 = smov 99   ;;  %s1721_s30 = smov 98  }
  0x57   :  { %2898 = vst [vmem:[#allocation18_spill] sm:$0xff] %v1950_v50  ;;  %v518_v63 = vrot.slane %v509_v46, %v1870_v9  ;;  %v1720_v4 = vmov 45   ;;  %s1722_s6 = smov 113   ;;  %v1723_v13 = vmov 19   ;;  %s1726_s7 = smov 30  }
  0x58   :  { %v1980_v60 = vmul.f32 %v627_v58, %v1888_v23  ;;  %s1729_s8 = smov 83   ;;  %s1731_s9 = smov 82   ;;  %v2077_v44 = vld [vmem:[#allocation8 + $0x6] ss:$8 sm:$0x3]  ;;  %v1742_v58 = vmov 47  }
  0x59   :  { %1481 = vset.pattern.permute.xlu1 %v1674_v10  ;;  %1483 = vset.pattern.permute.xlu0 %v1675_v11  ;;  %v1992_v0 = vmul.f32 %v518_v63, %v1875_v14  ;;  %v2013_v11 = vld [vmem:[#allocation8 + $0x5] ss:$8 sm:$0x3]  ;;  %s1732_s10 = smov 97   ;;  %s1733_s11 = smov 112   ;;  %v867_v46 = vrot.slane %v2077_v44, %v1883_v18 }
  0x5a   :  { %411 = vperm.xlu1 %1481, %v1858_v2   ;;  %224 = vperm.xlu0 %1483, %v1858_v2   ;;  %s1735_s2 = smov 47   ;;  %s1736_s13 = smov 127  }
  0x5b   :  { %2899 = vst [vmem:[#allocation19_spill] sm:$0xff] %v1992_v0  ;;  %s1738_s14 = smov 29  }
  0x5e   :  { %1482 = vset.pattern.permute.xlu1 %v1676_v15  ;;  %1486 = vset.pattern.permute.xlu0 %v1677_v16  ;;  %v747_v15 = vrot.slane %v2013_v11, %v1883_v18  ;;  %v1724_v16 = vmov 39  }
  0x5f   :  { %426 = vperm.xlu1 %1482, %v1858_v2   ;;  %531 = vperm.xlu0 %1486, %v1858_v2  }
  0x63   :  { %1484 = vset.pattern.permute.xlu1 %v1678_v20  ;;  %175 = vrot.lane.b32.xlu0 %v1880_v17, %s1679_s4  ;;  %v2024_v20 = vmul.f32 %v747_v15, %v1888_v23 }
  0x64   :  { %336 = vperm.xlu1 %1484, %v1858_v2   ;;  %1489 = vset.pattern.permute.xlu0 %v1680_v22  ;;  %v1725_v22 = vmov 13  }
  0x67   :  { %192 = vrot.lane.b32.xlu0 %v1880_v17, %s1681_s1 }
  0x68   :  { %1485 = vset.pattern.permute.xlu1 %v1682_v25  ;;  %v1727_v25 = vmov 33  }
  0x69   :  { %441 = vperm.xlu1 %1485, %v1858_v2  }
  0x6b   :  { %283 = vrot.lane.b32.xlu0 %v1892_v24, %s1683_s15 }
  0x6d   :  { %1487 = vset.pattern.permute.xlu1 %v1684_v27 }
  0x6e   :  { %546 = vperm.xlu1 %1487, %v1858_v2  }
  0x6f   :  { %298 = vrot.lane.b32.xlu0 %v1892_v24, %s1685_s16 }
  0x72   :  { %173 = vrot.lane.b32.xlu1 %v1900_v28, %s1679_s4  ;;  %s1741_s4 = smov 96  }
  0x73   :  { %1488 = vset.pattern.permute.xlu1 %v1686_v29  ;;  %351 = vperm.xlu0 %1489, %v1858_v2   ;;  %v1728_v29 = vmov 44  }
  0x76   :  { %190 = vrot.lane.b32.xlu1 %v1900_v28, %s1681_s1  ;;  %s1744_s1 = smov 111  }
  0x77   :  { %1492 = vset.pattern.permute.xlu0 %v1687_v31 }
  0x78   :  { %644 = vperm.xlu0 %1492, %v1858_v2  }
  0x7a   :  { %237 = vperm.xlu1 %1488, %v1858_v2  }
  0x7c   :  { %205 = vrot.lane.b32.xlu0 %v1880_v17, %s1688_s17 }
  0x7d   :  { %1495 = vset.pattern.permute.xlu0 %v1689_v33  ;;  %v1730_v33 = vmov 40  }
  0x7e   :  { %285 = vrot.lane.b32.xlu1 %v1910_v32, %s1683_s15 }
  0x7f   :  { %1490 = vset.pattern.permute.xlu1 %v1690_v34 }
  0x80   :  { %313 = vrot.lane.b32.xlu0 %v1892_v24, %s1691_s18 }
  0x82   :  { %300 = vrot.lane.b32.xlu1 %v1910_v32, %s1685_s16  ;;  %s1745_s16 = smov 126  }
  0x84   :  { %366 = vperm.xlu0 %1495, %v1858_v2  }
  0x86   :  { %456 = vperm.xlu1 %1490, %v1858_v2  }
  0x88   :  { %418 = vrot.lane.b32.xlu0 %v1922_v37, %s1692_s19 }
  0x89   :  { %1496 = vset.pattern.permute.xlu0 %v1693_v38  ;;  %v631_v38 = vrot.slane %v1970_v57, %v1870_v9  ;;  %v1740_v57 = vmov 20  }
  0x8a   :  { %1491 = vset.pattern.permute.xlu1 %v1694_v39 }
  0x8b   :  { %561 = vperm.xlu1 %1491, %v1858_v2  }
  0x8c   :  { %471 = vperm.xlu0 %1496, %v1858_v2  }
  0x8f   :  { %1493 = vset.pattern.permute.xlu1 %v1695_v40 }
  0x90   :  { %659 = vperm.xlu1 %1493, %v1858_v2   ;;  %1499 = vset.pattern.permute.xlu0 %v1696_v41  ;;  %v1734_v41 = vmov 26  }
  0x91   :  { %764 = vperm.xlu0 %1499, %v1858_v2  }
  0x94   :  { %203 = vrot.lane.b32.xlu1 %v1900_v28, %s1688_s17  ;;  %s1746_s17 = smov 15  }
  0x95   :  { %1494 = vset.pattern.permute.xlu1 %v1697_v42  ;;  %218 = vrot.lane.b32.xlu0 %v1880_v17, %s1698_s20  ;;  %v2070_v42 = vmul.f32 %v631_v38, %v1875_v14 }
  0x96   :  { %1502 = vset.pattern.permute.xlu0 %v1699_v43 }
  0x98   :  { %250 = vperm.xlu1 %1494, %v1858_v2  }
  0x99   :  { %328 = vrot.lane.b32.xlu0 %v1892_v24, %s1700_s22 }
  0x9c   :  { %315 = vrot.lane.b32.xlu1 %v1910_v32, %s1691_s18  ;;  %s1748_s18 = smov 46  }
  0x9d   :  { %1497 = vset.pattern.permute.xlu1 %v1701_v45  ;;  %381 = vperm.xlu0 %1502, %v1858_v2  }
  0xa0   :  { %403 = vrot.lane.b32.xlu1 %v1922_v37, %s1702_s23 }
  0xa1   :  { %1503 = vset.pattern.permute.xlu0 %v1703_v49 }
  0xa2   :  { %486 = vperm.xlu0 %1503, %v1858_v2  }
  0xa4   :  { %405 = vrot.lane.b32.xlu1 %v1943_v47, %s1702_s23 }
  0xa6   :  { %538 = vrot.lane.b32.xlu0 %v1950_v50, %s1704_s24 }
  0xa7   :  { %1504 = vset.pattern.permute.xlu0 %v1705_v51  ;;  %v2094_v51 = vmul.f32 %v867_v46, %v1888_v23 }
  0xa8   :  { %420 = vrot.lane.b32.xlu1 %v1943_v47, %s1692_s19  ;;  %s1749_s19 = smov 95  }
  0xaa   :  { %584 = vperm.xlu0 %1504, %v1858_v2  }
  0xac   :  { %569 = vperm.xlu1 %1497, %v1858_v2  }
  0xae   :  { %1507 = vset.pattern.permute.xlu0 %v1706_v52 }
  0xaf   :  { %884 = vperm.xlu0 %1507, %v1858_v2  }
  0xb0   :  { %1498 = vset.pattern.permute.xlu1 %v1707_v53 }
  0xb1   :  { %674 = vperm.xlu1 %1498, %v1858_v2  }
  0xb3   :  { %231 = vrot.lane.b32.xlu0 %v1880_v17, %s1708_s25 }
  0xb4   :  { %1510 = vset.pattern.permute.xlu0 %v1709_v54  ;;  %v1739_v54 = vmov 34  }
  0xb5   :  { %1500 = vset.pattern.permute.xlu1 %v1710_v55 }
  0xb6   :  { %779 = vperm.xlu1 %1500, %v1858_v2  }
  0xb7   :  { %345 = vrot.lane.b32.xlu0 %v1910_v32, %s1711_s26 }
  0xba   :  { %216 = vrot.lane.b32.xlu1 %v1900_v28, %s1698_s20  ;;  %s1751_s20 = smov 110  }
  0xbb   :  { %1501 = vset.pattern.permute.xlu1 %v1712_v56  ;;  %450 = vrot.lane.b32.xlu0 %v1943_v47, %s1713_s27 }
  0xbe   :  { %263 = vperm.xlu1 %1501, %v1858_v2  }
  0xbf   :  { %553 = vrot.lane.b32.xlu0 %v1950_v50, %s1667_s12 }
  0xc2   :  { %330 = vrot.lane.b32.xlu1 %v1910_v32, %s1700_s22  ;;  %s1752_s22 = smov 125  }
  0xc3   :  { %1505 = vset.pattern.permute.xlu1 %v1714_v59  ;;  %599 = vperm.xlu0 %1510, %v1858_v2  }
  0xc6   :  { %433 = vrot.lane.b32.xlu1 %v1922_v37, %s1715_s0 }
  0xc7   :  { %651 = vrot.lane.b32.xlu0 %v1980_v60, %s1716_s21 }
  0xc8   :  { %1511 = vset.pattern.permute.xlu0 %v1717_v61  ;;  %v1743_v61 = vmov 27  }
  0xca   :  { %v1985_v62 = vpop.permute.xlu1 %291  ;;  %435 = vrot.lane.b32.xlu1 %v1943_v47, %s1715_s0  ;;  %v2010_v10 = vpop.permute.xlu0 %185  ;;  %s1758_s0 = smov 77  }
  0xcb   :  { %704 = vperm.xlu0 %1511, %v1858_v2  }
  0xce   :  { %523 = vrot.lane.b32.xlu1 %v1950_v50, %s1718_s28 }
  0xcf   :  { %v1994_v3 = vpop.permute.xlu1 %306  ;;  %242 = vrot.lane.b32.xlu0 %v1900_v28, %s1719_s29  ;;  %v2020_v19 = vpop.permute.xlu0 %198 }
  0xd0   :  { %1514 = vset.pattern.permute.xlu0 %v1720_v4 }
  0xd2   :  { %525 = vrot.lane.b32.xlu1 %v1992_v0, %s1718_s28  ;;  %s1760_s28 = smov 81  }
  0xd3   :  { %358 = vrot.lane.b32.xlu0 %v1892_v24, %s1721_s30 }
  0xd4   :  { %v2001_v6 = vpop.permute.xlu1 %211  ;;  %v2031_v26 = vpop.permute.xlu0 %321 }
  0xd6   :  { %540 = vrot.lane.b32.xlu1 %v1992_v0, %s1704_s24  ;;  %s1753_s24 = smov 94  }
  0xd7   :  { %463 = vrot.lane.b32.xlu0 %v1922_v37, %s1722_s6 }
  0xd9   :  { %v2007_v7 = vpop.permute.xlu1 %411  ;;  %v2038_v30 = vpop.permute.xlu0 %224 }
  0xda   :  { %689 = vperm.xlu1 %1505, %v1858_v2   ;;  %2901 = vst [vmem:[#allocation21_spill] sm:$0xff] %v2038_v30 }
  0xdb   :  { %614 = vperm.xlu0 %1514, %v1858_v2  }
  0xde   :  { %v2015_v12 = vpop.permute.xlu1 %426  ;;  %1506 = vset.pattern.permute.xlu1 %v1723_v13  ;;  %v2052_v35 = vpop.permute.xlu0 %531 }
  0xdf   :  { %794 = vperm.xlu1 %1506, %v1858_v2   ;;  %1515 = vset.pattern.permute.xlu0 %v1724_v16 }
  0xe0   :  { %719 = vperm.xlu0 %1515, %v1858_v2  }
  0xe2   :  { %v2061_v39 = vpop.permute.xlu0 %175 }
  0xe3   :  { %v2026_v21 = vpop.permute.xlu1 %336  ;;  %1508 = vset.pattern.permute.xlu1 %v1725_v22  ;;  %v1747_v22 = vmov 41  }
  0xe4   :  { %2900 = vst [vmem:[#allocation20_spill] sm:$0xff] %v2026_v21  ;;  %899 = vperm.xlu1 %1508, %v1858_v2   ;;  %771 = vrot.lane.b32.xlu0 %v2024_v20, %s1726_s7 }
  0xe5   :  { %1516 = vset.pattern.permute.xlu0 %v1727_v25  ;;  %v751_v25 = vrot.slane %v2013_v11, %v1870_v9 }
  0xe6   :  { %v2079_v45 = vpop.permute.xlu0 %192 }
  0xe8   :  { %v2033_v27 = vpop.permute.xlu1 %441  ;;  %229 = vrot.lane.b32.xlu1 %v1900_v28, %s1708_s25  ;;  %824 = vperm.xlu0 %1516, %v1858_v2   ;;  %s1755_s25 = smov 109  }
  0xe9   :  { %1509 = vset.pattern.permute.xlu1 %v1728_v29 }
  0xea   :  { %v2088_v49 = vpop.permute.xlu0 %283 }
  0xec   :  { %343 = vrot.lane.b32.xlu1 %v1892_v24, %s1711_s26  ;;  %257 = vrot.lane.b32.xlu0 %v1880_v17, %s1729_s8  ;;  %s1756_s26 = smov 78  }
  0xed   :  { %v2044_v31 = vpop.permute.xlu1 %546  ;;  %1519 = vset.pattern.permute.xlu0 %v1730_v33  ;;  %v2149_v33 = vmul.f32 %v751_v25, %v1875_v14  ;;  %v1754_v25 = vmov 46  }
  0xee   :  { %2902 = vst [vmem:[#allocation22_spill] sm:$0xff] %v2044_v31  ;;  %v2098_v53 = vpop.permute.xlu0 %298 }
  0xf0   :  { %448 = vrot.lane.b32.xlu1 %v1922_v37, %s1713_s27  ;;  %375 = vrot.lane.b32.xlu0 %v1910_v32, %s1731_s9  ;;  %s1757_s27 = smov 93  }
  0xf1   :  { %v2050_v34 = vpop.permute.xlu1 %173 }
  0xf2   :  { %v2105_v56 = vpop.permute.xlu0 %351 }
  0xf4   :  { %501 = vperm.xlu1 %1509, %v1858_v2   ;;  %480 = vrot.lane.b32.xlu0 %v1943_v47, %s1732_s10 }
  0xf5   :  { %v2057_v36 = vpop.permute.xlu1 %190 }
  0xf7   :  { %v2115_v59 = vpop.permute.xlu0 %644 }
  0xf8   :  { %555 = vrot.lane.b32.xlu1 %v1992_v0, %s1667_s12  ;;  %578 = vrot.lane.b32.xlu0 %v1992_v0, %s1733_s11  ;;  %s1737_s12 = smov 14  }
  0xf9   :  { %v2067_v40 = vpop.permute.xlu1 %237  ;;  %1512 = vset.pattern.permute.xlu1 %v1734_v41  ;;  %v1750_v41 = vmov 48  }
  0xfb   :  { %v2125_v13 = vpop.permute.xlu0 %205 }
  0xfc   :  { %636 = vrot.lane.b32.xlu1 %v1980_v60, %s1735_s2  ;;  %683 = vrot.lane.b32.xlu0 %v2070_v42, %s1736_s13 }
  0xfd   :  { %v2075_v43 = vpop.permute.xlu1 %285 }
  0xff   :  { %v2133_v15 = vpop.permute.xlu0 %313 }
 0x100   :  { %638 = vrot.lane.b32.xlu1 %v2070_v42, %s1735_s2  ;;  %786 = vrot.lane.b32.xlu0 %v2024_v20, %s1737_s12 }
 0x101   :  { %v2086_v48 = vpop.permute.xlu1 %300 }
 0x103   :  { %v2139_v16 = vpop.permute.xlu0 %366 }
 0x104   :  { %653 = vrot.lane.b32.xlu1 %v2070_v42, %s1716_s21  ;;  %839 = vperm.xlu0 %1519, %v1858_v2   ;;  %s1759_s21 = smov 45  }
 0x105   :  { %v2096_v52 = vpop.permute.xlu1 %456 }
 0x106   :  { %2903 = vst [vmem:[#allocation23_spill] sm:$0xff] %v2096_v52 }
 0x107   :  { %v2153_v38 = vpop.permute.xlu0 %418 }
 0x108   :  { %809 = vperm.xlu1 %1512, %v1858_v2   ;;  %891 = vrot.lane.b32.xlu0 %v2094_v51, %s1738_s14 }
 0x109   :  { %1520 = vset.pattern.permute.xlu0 %v1739_v54 }
 0x10a   :  { %v2103_v55 = vpop.permute.xlu1 %561 }
 0x10b   :  { %v2160_v11 = vpop.permute.xlu0 %471 }
 0x10c   :  { %1513 = vset.pattern.permute.xlu1 %v1740_v57  ;;  %944 = vperm.xlu0 %1520, %v1858_v2  }
 0x10d   :  { %914 = vperm.xlu1 %1513, %v1858_v2  }
 0x10f   :  { %v2109_v23 = vpop.permute.xlu1 %659 }
 0x110   :  { %2904 = vst [vmem:[#allocation24_spill] sm:$0xff] %v2109_v23  ;;  %591 = vrot.lane.b32.xlu0 %v1950_v50, %s1741_s4 }
 0x111   :  { %244 = vrot.lane.b32.xlu1 %v1880_v17, %s1719_s29  ;;  %1521 = vset.pattern.permute.xlu0 %v1742_v58  ;;  %v2170_v58 = vpop.permute.xlu0 %764  ;;  %s1761_s29 = smov 13  }
 0x112   :  { %1517 = vset.pattern.permute.xlu1 %v1743_v61  ;;  %2906 = vst [vmem:[#allocation26_spill] sm:$0xff] %v2170_v58 }
 0x113   :  { %v2117_v63 = vpop.permute.xlu1 %203 }
 0x114   :  { %696 = vrot.lane.b32.xlu0 %v1980_v60, %s1744_s1 }
 0x115   :  { %360 = vrot.lane.b32.xlu1 %v1910_v32, %s1721_s30  ;;  %s1762_s30 = smov 80  }
 0x117   :  { %v2123_v4 = vpop.permute.xlu1 %250 }
 0x118   :  { %801 = vrot.lane.b32.xlu0 %v2024_v20, %s1745_s16 }
 0x119   :  { %465 = vrot.lane.b32.xlu1 %v1943_v47, %s1722_s6  ;;  %s1763_s6 = smov 79  }
 0x11b   :  { %v2131_v17 = vpop.permute.xlu1 %315 }
 0x11c   :  { %854 = vperm.xlu0 %1521, %v1858_v2  }
 0x11d   :  { %666 = vrot.lane.b32.xlu1 %v1980_v60, %s1746_s17 }
 0x11f   :  { %v2137_v32 = vpop.permute.xlu1 %403 }
 0x120   :  { %1522 = vset.pattern.permute.xlu0 %v1747_v22  ;;  %v2180_v22 = vpop.permute.xlu0 %218 }
 0x121   :  { %668 = vrot.lane.b32.xlu1 %v2070_v42, %s1746_s17  ;;  %959 = vperm.xlu0 %1522, %v1858_v2   ;;  %2908 = vst [vmem:[#allocation28_spill] sm:$0xff] %v2180_v22  ;;  %v2926_v22 = vlaneseq }
 0x123   :  { %v2145_v29 = vpop.permute.xlu1 %405 }
 0x125   :  { %756 = vrot.lane.b32.xlu1 %v2024_v20, %s1748_s18  ;;  %711 = vrot.lane.b32.xlu0 %v1980_v60, %s1749_s19 }
 0x126   :  { %1523 = vset.pattern.permute.xlu0 %v1750_v41 }
 0x127   :  { %v2155_v46 = vpop.permute.xlu1 %420 }
 0x129   :  { %758 = vrot.lane.b32.xlu1 %v2149_v33, %s1748_s18  ;;  %816 = vrot.lane.b32.xlu0 %v2024_v20, %s1751_s20 }
 0x12b   :  { %v2162_v54 = vpop.permute.xlu1 %569 }
 0x12c   :  { %2905 = vst [vmem:[#allocation25_spill] sm:$0xff] %v2162_v54 }
 0x12d   :  { %773 = vrot.lane.b32.xlu1 %v2149_v33, %s1726_s7  ;;  %921 = vrot.lane.b32.xlu0 %v2094_v51, %s1752_s22 }
 0x130   :  { %v2168_v57 = vpop.permute.xlu1 %674 }
 0x131   :  { %929 = vperm.xlu1 %1517, %v1858_v2   ;;  %974 = vperm.xlu0 %1523, %v1858_v2  }
 0x135   :  { %255 = vrot.lane.b32.xlu1 %v1900_v28, %s1729_s8  ;;  %v2176_v61 = vpop.permute.xlu1 %779  ;;  %831 = vrot.lane.b32.xlu0 %v2024_v20, %s1753_s24  ;;  %v2188_v28 = vpop.permute.xlu0 %328 }
 0x136   :  { %2907 = vst [vmem:[#allocation27_spill] sm:$0xff] %v2176_v61  ;;  %1518 = vset.pattern.permute.xlu1 %v1754_v25  ;;  %2910 = vst [vmem:[#allocation30_spill] sm:$0xff] %v2188_v28  ;;  %v2289_v61 = vand.u32 127, %v2926_v22 }
 0x138   :  { %vm287_vm0 = vcmp.lt.s32.totalorder %v2289_v61, 50  ;;  %vm179_vm1 = vcmp.lt.s32.totalorder %v2289_v61, 51  ;;  %vm194_vm2 = vcmp.lt.s32.totalorder %v2289_v61, 35  ;;  %vm207_vm3 = vcmp.lt.s32.totalorder %v2289_v61, 19 }
 0x139   :  { %373 = vrot.lane.b32.xlu1 %v1892_v24, %s1731_s9  ;;  %v2184_v41 = vpop.permute.xlu1 %216  ;;  %936 = vrot.lane.b32.xlu0 %v2094_v51, %s1755_s25  ;;  %v2196_v25 = vpop.permute.xlu0 %381  ;;  %v289_v22 = vsel %vm287_vm0, %v2075_v43, %v2088_v49  ;;  %v180_v58 = vsel %vm179_vm1, %v2050_v34, %v2061_v39  ;;  %v195_v31 = vsel %vm194_vm2, %v2057_v36, %v2079_v45  ;;  %vm302_vm4 = vcmp.lt.s32.totalorder %v2289_v61, 34  ;;  %s1765_s9 = smov 123  }
 0x13a   :  { %2909 = vst [vmem:[#allocation29_spill] sm:$0xff] %v2184_v41  ;;  %2912 = vst [vmem:[#allocation32_spill] sm:$0xff] %v2196_v25  ;;  %vm317_vm5 = vcmp.lt.s32.totalorder %v2289_v61, 18  ;;  %vm437_vm6 = vcmp.lt.s32.totalorder %v2289_v61, 17  ;;  %vm246_vm7 = vcmp.lt.s32.totalorder %v2289_v61, 99  ;;  %vm233_vm8 = vcmp.lt.s32.totalorder %v2289_v61, 115 }
 0x13b   :  { %vm347_vm9 = vcmp.lt.s32.totalorder %v2289_v61, 114  ;;  %vm557_vm10 = vcmp.lt.s32.totalorder %v2289_v61, 16  ;;  %vm407_vm11 = vcmp.lt.s32.totalorder %v2289_v61, 49  ;;  %vm422_vm12 = vcmp.lt.s32.totalorder %v2289_v61, 33 }
 0x13c   :  { %vm362_vm13 = vcmp.lt.s32.totalorder %v2289_v61, 98  ;;  %vm467_vm14 = vcmp.lt.s32.totalorder %v2289_v61, 113  ;;  %vm527_vm15 = vcmp.lt.s32.totalorder %v2289_v61, 48 }
 0x13d   :  { %478 = vrot.lane.b32.xlu1 %v1922_v37, %s1732_s10  ;;  %v2192_v1 = vpop.permute.xlu1 %263  ;;  %846 = vrot.lane.b32.xlu0 %v2024_v20, %s1756_s26  ;;  %v2204_v5 = vpop.permute.xlu0 %486  ;;  %s1766_s10 = smov 122  }
 0x13e   :  { %2911 = vst [vmem:[#allocation31_spill] sm:$0xff] %v2192_v1  ;;  %2914 = vst [vmem:[#allocation34_spill] sm:$0xff] %v2204_v5  ;;  %v871_v5 = vrot.slane %v2077_v44, %v1870_v9 }
 0x141   :  { %576 = vrot.lane.b32.xlu1 %v1950_v50, %s1733_s11  ;;  %v2200_v24 = vpop.permute.xlu1 %330  ;;  %951 = vrot.lane.b32.xlu0 %v2094_v51, %s1757_s27  ;;  %v2215_v18 = vpop.permute.xlu0 %538  ;;  %s1767_s11 = smov 121  }
 0x142   :  { %2913 = vst [vmem:[#allocation33_spill] sm:$0xff] %v2200_v24 }
 0x145   :  { %681 = vrot.lane.b32.xlu1 %v1980_v60, %s1736_s13  ;;  %v2208_v8 = vpop.permute.xlu1 %433  ;;  %966 = vrot.lane.b32.xlu0 %v2094_v51, %s1758_s0  ;;  %v2223_v52 = vpop.permute.xlu0 %584 }
 0x146   :  { %2915 = vst [vmem:[#allocation35_spill] sm:$0xff] %v2223_v52 }
 0x149   :  { %734 = vperm.xlu1 %1518, %v1858_v2   ;;  %v2213_v20 = vpop.permute.xlu1 %435  ;;  %v2229_v2 = vmul.f32 %v871_v5, %v1875_v14  ;;  %v2231_v30 = vpop.permute.xlu0 %884 }
 0x14a   :  { %2916 = vst [vmem:[#allocation36_spill] sm:$0xff] %v2231_v30 }
 0x14d   :  { %v2217_v54 = vpop.permute.xlu1 %523  ;;  %788 = vrot.lane.b32.xlu1 %v2149_v33, %s1737_s12  ;;  %v2240_v44 = vpop.permute.xlu0 %231 }
 0x151   :  { %v2225_v21 = vpop.permute.xlu1 %525  ;;  %876 = vrot.lane.b32.xlu1 %v2094_v51, %s1759_s21  ;;  %v2245_v5 = vpop.permute.xlu0 %345 }
 0x155   :  { %v2233_v25 = vpop.permute.xlu1 %540  ;;  %878 = vrot.lane.b32.xlu1 %v2229_v2, %s1759_s21  ;;  %v2252_v30 = vpop.permute.xlu0 %450 }
 0x156   :  { %2920 = vst [vmem:[#allocation40_spill] sm:$0xff] %v2252_v30 }
 0x159   :  { %v2236_v1 = vpop.permute.xlu1 %689  ;;  %893 = vrot.lane.b32.xlu1 %v2229_v2, %s1738_s14  ;;  %v2258_v52 = vpop.permute.xlu0 %553 }
 0x15a   :  { %2917 = vst [vmem:[#allocation37_spill] sm:$0xff] %v2236_v1 }
 0x15d   :  { %493 = vrot.lane.b32.xlu1 %v1922_v37, %s1760_s28 }
 0x15e   :  { %v2243_v9 = vpop.permute.xlu1 %794 }
 0x15f   :  { %2918 = vst [vmem:[#allocation38_spill] sm:$0xff] %v2243_v9 }
 0x161   :  { %495 = vrot.lane.b32.xlu1 %v1943_v47, %s1760_s28  ;;  %v2264_v47 = vpop.permute.xlu0 %599 }
 0x162   :  { %2921 = vst [vmem:[#allocation41_spill] sm:$0xff] %v2264_v47 }
 0x163   :  { %v2248_v14 = vpop.permute.xlu1 %899 }
 0x164   :  { %2919 = vst [vmem:[#allocation39_spill] sm:$0xff] %v2248_v14 }
 0x165   :  { %593 = vrot.lane.b32.xlu1 %v1992_v0, %s1741_s4  ;;  %v2271_v30 = vpop.permute.xlu0 %651 }
 0x166   :  { %2924 = vst [vmem:[#allocation44_spill] sm:$0xff] %v2271_v30  ;;  %v196_v30 = vsel %vm194_vm2, %v2079_v45, %v2057_v36  ;;  %vm655_vm2 = vcmp.lt.s32.totalorder %v2289_v61, 31 }
 0x167   :  { %v2254_v1 = vpop.permute.xlu1 %229 }
 0x169   :  { %698 = vrot.lane.b32.xlu1 %v2070_v42, %s1744_s1  ;;  %v2276_v24 = vpop.permute.xlu0 %704 }
 0x16a   :  { %2925 = vst [vmem:[#allocation45_spill] sm:$0xff] %v2276_v24 }
 0x16b   :  { %v2260_v37 = vpop.permute.xlu1 %343 }
 0x16d   :  { %803 = vrot.lane.b32.xlu1 %v2149_v33, %s1745_s16  ;;  %v243_v47 = vpop.permute.xlu0 %242 }
 0x16f   :  { %v2266_v14 = vpop.permute.xlu1 %448 }
 0x170   :  { %2922 = vst [vmem:[#allocation42_spill] sm:$0xff] %v2266_v14 }
 0x171   :  { %906 = vrot.lane.b32.xlu1 %v2094_v51, %s1761_s29 }
 0x173   :  { %v2269_v9 = vpop.permute.xlu1 %501 }
 0x174   :  { %2923 = vst [vmem:[#allocation43_spill] sm:$0xff] %v2269_v9  ;;  %v359_v9 = vpop.permute.xlu0 %358 }
 0x175   :  { %908 = vrot.lane.b32.xlu1 %v2229_v2, %s1761_s29 }
 0x177   :  { %v2274_v28 = vpop.permute.xlu1 %555 }
 0x179   :  { %606 = vrot.lane.b32.xlu1 %v1950_v50, %s1762_s30  ;;  %v2304_v50 = vpop.permute.xlu0 %463 }
 0x17b   :  { %v2279_v41 = vpop.permute.xlu1 %636 }
 0x17d   :  { %608 = vrot.lane.b32.xlu1 %v1992_v0, %s1762_s30  ;;  %v288_v0 = vsel %vm287_vm0, %v2088_v49, %v2075_v43  ;;  %v294_v43 = vmul.f32 %v1985_v62, %v289_v22  ;;  %v349_v22 = vsel %vm347_vm9, %v2245_v5, %v2260_v37  ;;  %vm640_vm0 = vcmp.lt.s32.totalorder %v2289_v61, 47 }
 0x17e   :  { %v295_v49 = vmul.f32 %v1985_v62, %v288_v0  ;;  %v2335_v62 = vmul.f32 %v2020_v19, %v195_v31  ;;  %v209_v0 = vsel %vm207_vm3, %v2125_v13, %v2117_v63  ;;  %v348_v31 = vsel %vm347_vm9, %v2260_v37, %v2245_v5 }
 0x17f   :  { %v2282_v14 = vpop.permute.xlu1 %638  ;;  %v318_v5 = vsel %vm317_vm5, %v2133_v15, %v2131_v17  ;;  %v319_v37 = vsel %vm317_vm5, %v2131_v17, %v2133_v15  ;;  %vm775_vm5 = vcmp.lt.s32.totalorder %v2289_v61, 30  ;;  %vm377_vm9 = vcmp.lt.s32.totalorder %v2289_v61, 82 }
 0x181   :  { %713 = vrot.lane.b32.xlu1 %v2070_v42, %s1749_s19 }
 0x183   :  { %v2286_v51 = vpop.permute.xlu1 %653 }
 0x185   :  { %818 = vrot.lane.b32.xlu1 %v2149_v33, %s1751_s20 }
 0x187   :  { %v2294_v24 = vpop.permute.xlu1 %809 }
 0x188   :  { %2927 = vst [vmem:[#allocation46_spill] sm:$0xff] %v2294_v24  ;;  %v181_v24 = vsel %vm179_vm1, %v2061_v39, %v2050_v34  ;;  %v2325_v34 = vpop.permute.xlu0 %614  ;;  %v189_v39 = vmul.f32 %v2010_v10, %v180_v58  ;;  %vm542_vm1 = vcmp.lt.s32.totalorder %v2289_v61, 32 }
 0x189   :  { %923 = vrot.lane.b32.xlu1 %v2229_v2, %s1752_s22  ;;  %v188_v36 = vmul.f32 %v2010_v10, %v181_v24 }
 0x18a   :  { %v2344_v10 = vadd.f32 %v295_v49, %v189_v39  ;;  %v354_v49 = vmul.f32 %v2105_v56, %v348_v31 }
 0x18b   :  { %v2342_v24 = vadd.f32 %v294_v43, %v188_v36  ;;  %v214_v43 = vmul.f32 %v2001_v6, %v209_v0  ;;  %v355_v36 = vmul.f32 %v2105_v56, %v349_v22 }
 0x18c   :  { %v2311_v23 = vpop.permute.xlu1 %914 }
 0x18d   :  { %726 = vrot.lane.b32.xlu1 %v1980_v60, %s1763_s6  ;;  %v2332_v60 = vmul.f32 %v2020_v19, %v196_v30  ;;  %v303_v19 = vsel %vm302_vm4, %v2098_v53, %v2086_v48 }
 0x190   :  { %v245_v45 = vpop.permute.xlu1 %244 }
 0x191   :  { %v247_v58 = vsel %vm246_vm7, %v243_v47, %v245_v45  ;;  %v248_v30 = vsel %vm246_vm7, %v245_v45, %v243_v47  ;;  %728 = vrot.lane.b32.xlu1 %v2070_v42, %s1763_s6  ;;  %v304_v42 = vsel %vm302_vm4, %v2086_v48, %v2098_v53  ;;  %v208_v47 = vsel %vm207_vm3, %v2117_v63, %v2125_v13  ;;  %v2385_v13 = vpop.permute.xlu0 %719 }
 0x192   :  { %v234_v48 = vsel %vm233_vm8, %v2254_v1, %v2240_v44  ;;  %v235_v53 = vsel %vm233_vm8, %v2240_v44, %v2254_v1  ;;  %2928 = vst [vmem:[#allocation47_spill] sm:$0xff] %v2385_v13  ;;  %v253_v39 = vmul.f32 %v2123_v4, %v247_v58  ;;  %v254_v0 = vmul.f32 %v2123_v4, %v248_v30 }
 0x193   :  { %v324_v45 = vmul.f32 %v2031_v26, %v319_v37  ;;  %v325_v13 = vmul.f32 %v2031_v26, %v318_v5  ;;  %v240_v31 = vmul.f32 %v2067_v40, %v234_v48  ;;  %v241_v56 = vmul.f32 %v2067_v40, %v235_v53 }
 0x194   :  { %v361_v63 = vpop.permute.xlu1 %360  ;;  %v439_v4 = vsel %vm437_vm6, %v2213_v20, %v2208_v8  ;;  %v215_v53 = vmul.f32 %v2001_v6, %v208_v47  ;;  %vm670_vm3 = vcmp.lt.s32.totalorder %v2289_v61, 15  ;;  %vm760_vm4 = vcmp.lt.s32.totalorder %v2289_v61, 46 }
 0x195   :  { %v363_v17 = vsel %vm362_vm13, %v359_v9, %v361_v63  ;;  %v364_v15 = vsel %vm362_vm13, %v361_v63, %v359_v9  ;;  %833 = vrot.lane.b32.xlu1 %v2149_v33, %s1753_s24  ;;  %v438_v9 = vsel %vm437_vm6, %v2208_v8, %v2213_v20  ;;  %v356_v30 = vadd.f32 %v354_v49, %v240_v31 }
 0x196   :  { %v369_v1 = vmul.f32 %v2139_v16, %v363_v17  ;;  %v370_v44 = vmul.f32 %v2139_v16, %v364_v15  ;;  %v357_v22 = vadd.f32 %v355_v36, %v241_v56  ;;  %v558_v8 = vsel %vm557_vm10, %v2258_v52, %v2274_v28 }
 0x197   :  { %v559_v20 = vsel %vm557_vm10, %v2274_v28, %v2258_v52  ;;  %v326_v63 = vadd.f32 %v324_v45, %v214_v43  ;;  %v444_v49 = vmul.f32 %v2033_v27, %v439_v4  ;;  %v445_v36 = vmul.f32 %v2033_v27, %v438_v9 }
 0x198   :  { %v2409_v16 = vadd.f32 %v369_v1, %v253_v39  ;;  %v2411_v58 = vadd.f32 %v370_v44, %v254_v0  ;;  %v466_v26 = vpop.permute.xlu1 %465  ;;  %v408_v17 = vsel %vm407_vm11, %v2137_v32, %v2145_v29  ;;  %v409_v52 = vsel %vm407_vm11, %v2145_v29, %v2137_v32 }
 0x199   :  { %v468_v40 = vsel %vm467_vm14, %v2304_v50, %v466_v26  ;;  %v469_v5 = vsel %vm467_vm14, %v466_v26, %v2304_v50  ;;  %938 = vrot.lane.b32.xlu1 %v2229_v2, %s1755_s25  ;;  %v2432_v50 = vpop.permute.xlu0 %771  ;;  %v327_v47 = vadd.f32 %v325_v13, %v215_v53  ;;  %v424_v27 = vsel %vm422_vm12, %v2155_v46, %v2153_v38 }
 0x19a   :  { %v474_v37 = vmul.f32 %v2160_v11, %v468_v40  ;;  %v475_v48 = vmul.f32 %v2160_v11, %v469_v5  ;;  %v564_v43 = vmul.f32 %v2103_v55, %v559_v20  ;;  %v565_v15 = vmul.f32 %v2103_v55, %v558_v8 }
 0x19b   :  { %v309_v32 = vmul.f32 %v1994_v3, %v304_v42  ;;  %v310_v29 = vmul.f32 %v1994_v3, %v303_v19  ;;  %v414_v13 = vmul.f32 %v2007_v7, %v409_v52  ;;  %v415_v39 = vmul.f32 %v2007_v7, %v408_v17 }
 0x19c   :  { %v2445_v11 = vadd.f32 %v474_v37, %v356_v30  ;;  %v2447_v28 = vadd.f32 %v475_v48, %v357_v22  ;;  %v667_v6 = vpop.permute.xlu1 %666  ;;  %v446_v0 = vadd.f32 %v444_v49, %v326_v63  ;;  %v447_v1 = vadd.f32 %v445_v36, %v327_v47  ;;  %v2929_v48 = vld [vmem:[#allocation44_spill] sm:$0xff] }
 0x19d   :  { %848 = vrot.lane.b32.xlu1 %v2149_v33, %s1756_s26  ;;  %v423_v55 = vsel %vm422_vm12, %v2153_v38, %v2155_v46  ;;  %v429_v33 = vmul.f32 %v2015_v12, %v424_v27  ;;  %v528_v3 = vsel %vm527_vm15, %v2217_v54, %v2225_v21  ;;  %v529_v19 = vsel %vm527_vm15, %v2225_v21, %v2217_v54  ;;  %v2476_v42 = vpop.permute.xlu0 %824 }
 0x19e   :  { %v566_v44 = vadd.f32 %v564_v43, %v446_v0  ;;  %v567_v45 = vadd.f32 %v565_v15, %v447_v1  ;;  %v641_v38 = vsel %vm640_vm0, %v2279_v41, %v2282_v14  ;;  %v642_v21 = vsel %vm640_vm0, %v2282_v14, %v2279_v41  ;;  %v2932_v43 = vld [vmem:[#allocation26_spill] sm:$0xff] }
 0x19f   :  { %v311_v9 = vadd.f32 %v309_v32, %v2332_v60  ;;  %v416_v4 = vadd.f32 %v414_v13, %v2342_v24  ;;  %v534_v26 = vmul.f32 %v2052_v35, %v529_v19  ;;  %v535_v30 = vmul.f32 %v2052_v35, %v528_v3 }
 0x1a0   :  { %v669_v7 = vpop.permute.xlu1 %668  ;;  %v417_v22 = vadd.f32 %v415_v39, %v2344_v10  ;;  %v430_v40 = vmul.f32 %v2015_v12, %v423_v55  ;;  %v544_v14 = vsel %vm542_vm1, %v2233_v25, %v2215_v18  ;;  %v647_v35 = vmul.f32 %v2115_v59, %v642_v21 }
 0x1a1   :  { %v671_v31 = vsel %vm670_vm3, %v667_v6, %v669_v7  ;;  %v672_v56 = vsel %vm670_vm3, %v669_v7, %v667_v6  ;;  %953 = vrot.lane.b32.xlu1 %v2229_v2, %s1757_s27  ;;  %v648_v60 = vmul.f32 %v2115_v59, %v641_v38  ;;  %v312_v12 = vadd.f32 %v310_v29, %v2335_v62  ;;  %v258_v10 = vpop.permute.xlu0 %257  ;;  %v2931_v6 = vld [vmem:[#allocation24_spill] sm:$0xff]  ;;  %v2933_v7 = vld [vmem:[#allocation27_spill] sm:$0xff] }
 0x1a2   :  { %v677_v46 = vmul.f32 %v2168_v57, %v672_v56  ;;  %v678_v54 = vmul.f32 %v2168_v57, %v671_v31  ;;  %v543_v57 = vsel %vm542_vm1, %v2215_v18, %v2233_v25  ;;  %v431_v24 = vadd.f32 %v429_v33, %v311_v9  ;;  %v2934_v9 = vld [vmem:[#allocation28_spill] sm:$0xff] }
 0x1a3   :  { %v536_v20 = vadd.f32 %v534_v26, %v416_v4  ;;  %v537_v37 = vadd.f32 %v535_v30, %v417_v22  ;;  %v656_v18 = vsel %vm655_vm2, %v2929_v48, %v2286_v51  ;;  %v657_v59 = vsel %vm655_vm2, %v2286_v51, %v2929_v48  ;;  %v2935_v4 = vld [vmem:[#allocation29_spill] sm:$0xff] }
 0x1a4   :  { %v2496_v5 = vadd.f32 %v677_v46, %v566_v44  ;;  %v2498_v8 = vadd.f32 %v678_v54, %v567_v45  ;;  %v757_v41 = vpop.permute.xlu1 %756  ;;  %v432_v25 = vadd.f32 %v430_v40, %v312_v12  ;;  %v662_v47 = vmul.f32 %v2931_v6, %v657_v59  ;;  %v2940_v59 = vld [vmem:[#allocation21_spill] sm:$0xff] }
 0x1a5   :  { %968 = vrot.lane.b32.xlu1 %v2229_v2, %s1758_s0  ;;  %v2930_v2 = vld [vmem:[#allocation22_spill] sm:$0xff]  ;;  %v649_v49 = vadd.f32 %v647_v35, %v536_v20  ;;  %v650_v36 = vadd.f32 %v648_v60, %v537_v37  ;;  %v663_v27 = vmul.f32 %v2931_v6, %v656_v18  ;;  %v376_v1 = vpop.permute.xlu0 %375  ;;  %vm259_vm6 = vcmp.lt.s32.totalorder %v2289_v61, 83  ;;  %v2939_v37 = vld [vmem:[#allocation32_spill] sm:$0xff] }
 0x1a6   :  { %v549_v53 = vmul.f32 %v2930_v2, %v544_v14  ;;  %v550_v62 = vmul.f32 %v2930_v2, %v543_v57  ;;  %vm220_vm7 = vcmp.lt.s32.totalorder %v2289_v61, 3  ;;  %vm332_vm8 = vcmp.lt.s32.totalorder %v2289_v61, 2  ;;  %v2937_v57 = vld [vmem:[#allocation30_spill] sm:$0xff]  ;;  %v2941_v2 = vld [vmem:[#allocation40_spill] sm:$0xff] }
 0x1a7   :  { %v221_v26 = vsel %vm220_vm7, %v2935_v4, %v2934_v9  ;;  %v222_v30 = vsel %vm220_vm7, %v2934_v9, %v2935_v4  ;;  %vm452_vm10 = vcmp.lt.s32.totalorder %v2289_v61, 1  ;;  %vm482_vm11 = vcmp.lt.s32.totalorder %v2289_v61, 97  ;;  %v2946_v9 = vld [vmem:[#allocation35_spill] sm:$0xff] }
 0x1a8   :  { %v759_v63 = vpop.permute.xlu1 %758  ;;  %v551_v32 = vadd.f32 %v549_v53, %v431_v24  ;;  %v552_v29 = vadd.f32 %v550_v62, %v432_v25  ;;  %v2938_v24 = vld [vmem:[#allocation31_spill] sm:$0xff]  ;;  %v227_v25 = vmul.f32 %v2940_v59, %v222_v30  ;;  %v2942_v53 = vld [vmem:[#allocation42_spill] sm:$0xff]  ;;  %vm580_vm12 = vcmp.lt.s32.totalorder %v2289_v61, 112 }
 0x1a9   :  { %v761_v17 = vsel %vm760_vm4, %v757_v41, %v759_v63  ;;  %v762_v52 = vsel %vm760_vm4, %v759_v63, %v757_v41  ;;  %v481_v21 = vpop.permute.xlu0 %480  ;;  %v2936_v41 = vld [vmem:[#allocation33_spill] sm:$0xff]  ;;  %v453_v62 = vsel %vm452_vm10, %v2942_v53, %v2941_v2  ;;  %v454_v63 = vsel %vm452_vm10, %v2941_v2, %v2942_v53 }
 0x1aa   :  { %v767_v15 = vmul.f32 %v2932_v43, %v762_v52  ;;  %v768_v51 = vmul.f32 %v2932_v43, %v761_v17  ;;  %v664_v3 = vadd.f32 %v662_v47, %v551_v32  ;;  %v665_v19 = vadd.f32 %v663_v27, %v552_v29 }
 0x1ab   :  { %v333_v14 = vsel %vm332_vm8, %v2937_v57, %v2936_v41  ;;  %v334_v35 = vsel %vm332_vm8, %v2936_v41, %v2937_v57  ;;  %v228_v27 = vmul.f32 %v2940_v59, %v221_v26  ;;  %vm685_vm13 = vcmp.lt.s32.totalorder %v2289_v61, 127  ;;  %v2948_v41 = vld [vmem:[#allocation25_spill] sm:$0xff] }
 0x1ac   :  { %v2529_v13 = vadd.f32 %v767_v15, %v649_v49  ;;  %v2531_v39 = vadd.f32 %v768_v51, %v650_v36  ;;  %v774_v0 = vpop.permute.xlu1 %773  ;;  %v2943_v49 = vld [vmem:[#allocation20_spill] sm:$0xff]  ;;  %v2944_v51 = vld [vmem:[#allocation23_spill] sm:$0xff]  ;;  %vm790_vm14 = vcmp.lt.s32.totalorder %v2289_v61, 14  ;;  %vm880_vm15 = vcmp.lt.s32.totalorder %v2289_v61, 45 }
 0x1ad   :  { %v776_v55 = vsel %vm775_vm5, %v2432_v50, %v774_v0  ;;  %v777_v33 = vsel %vm775_vm5, %v774_v0, %v2432_v50  ;;  %v579_v40 = vpop.permute.xlu0 %578  ;;  %v339_v36 = vmul.f32 %v2943_v49, %v334_v35  ;;  %v340_v17 = vmul.f32 %v2943_v49, %v333_v14  ;;  %v2945_v0 = vld [vmem:[#allocation34_spill] sm:$0xff] }
 0x1ae   :  { %v782_v44 = vmul.f32 %v2933_v7, %v777_v33  ;;  %v783_v45 = vmul.f32 %v2933_v7, %v776_v55  ;;  %v459_v32 = vmul.f32 %v2944_v51, %v454_v63  ;;  %v460_v29 = vmul.f32 %v2944_v51, %v453_v62  ;;  %v2951_v63 = vld [vmem:[#allocation38_spill] sm:$0xff] }
 0x1af   :  { %vm895_vm0 = vcmp.lt.s32.totalorder %v2289_v61, 29  ;;  %vm497_vm1 = vcmp.lt.s32.totalorder %v2289_v61, 81  ;;  %vm595_vm2 = vcmp.lt.s32.totalorder %v2289_v61, 96  ;;  %vm700_vm3 = vcmp.lt.s32.totalorder %v2289_v61, 111 }
 0x1b0   :  { %v2541_v31 = vadd.f32 %v782_v44, %v664_v3  ;;  %v2543_v56 = vadd.f32 %v783_v45, %v665_v19  ;;  %v2545_v38 = vpop.permute.xlu1 %929  ;;  %v341_v3 = vadd.f32 %v339_v36, %v227_v25  ;;  %v342_v19 = vadd.f32 %v340_v17, %v228_v27 }
 0x1b1   :  { %v684_v33 = vpop.permute.xlu0 %683  ;;  %vm805_vm4 = vcmp.lt.s32.totalorder %v2289_v61, 126  ;;  %vm910_vm5 = vcmp.lt.s32.totalorder %v2289_v61, 13  ;;  %vm715_vm7 = vcmp.lt.s32.totalorder %v2289_v61, 95  ;;  %vm820_vm8 = vcmp.lt.s32.totalorder %v2289_v61, 110 }
 0x1b2   :  { %vm730_vm10 = vcmp.lt.s32.totalorder %v2289_v61, 79 }
 0x1b4   :  { %v256_v46 = vpop.permute.xlu1 %255 }
 0x1b5   :  { %v260_v54 = vsel %vm259_vm6, %v256_v46, %v258_v10  ;;  %v261_v50 = vsel %vm259_vm6, %v258_v10, %v256_v46  ;;  %v787_v30 = vpop.permute.xlu0 %786  ;;  %vm610_vm6 = vcmp.lt.s32.totalorder %v2289_v61, 80 }
 0x1b6   :  { %v266_v10 = vmul.f32 %v2938_v24, %v260_v54  ;;  %v267_v20 = vmul.f32 %v2938_v24, %v261_v50  ;;  %v461_v54 = vadd.f32 %v459_v32, %v341_v3  ;;  %v462_v50 = vadd.f32 %v460_v29, %v342_v19  ;;  %v982_v29 = vld [vmem:[#allocation8 + $0x7] ss:$8 sm:$0x3] }
 0x1b8   :  { %v374_v22 = vpop.permute.xlu1 %373 }
 0x1b9   :  { %v378_v60 = vsel %vm377_vm9, %v374_v22, %v376_v1  ;;  %v379_v12 = vsel %vm377_vm9, %v376_v1, %v374_v22  ;;  %v2947_v22 = vld [vmem:[#allocation18_spill] sm:$0xff]  ;;  %vm925_vm9 = vcmp.lt.s32.totalorder %v2289_v61, 125 }
 0x1ba   :  { %v384_v48 = vmul.f32 %v2939_v37, %v378_v60  ;;  %v385_v18 = vmul.f32 %v2939_v37, %v379_v12  ;;  %v572_v57 = vmul.f32 %v2948_v41, %v2947_v22 }
 0x1bc   :  { %v2572_v52 = vadd.f32 %v384_v48, %v266_v10  ;;  %v2574_v6 = vadd.f32 %v385_v18, %v267_v20  ;;  %v479_v47 = vpop.permute.xlu1 %478  ;;  %v574_v24 = vadd.f32 %v572_v57, %v461_v54  ;;  %v2950_v20 = vld [vmem:[#allocation37_spill] sm:$0xff]  ;;  %v2607_v18 = vpop.permute.xlu0 %839 }
 0x1bd   :  { %v483_v43 = vsel %vm482_vm11, %v479_v47, %v481_v21  ;;  %v484_v15 = vsel %vm482_vm11, %v481_v21, %v479_v47  ;;  %vm835_vm11 = vcmp.lt.s32.totalorder %v2289_v61, 94 }
 0x1be   :  { %v489_v1 = vmul.f32 %v2945_v0, %v483_v43  ;;  %v490_v55 = vmul.f32 %v2945_v0, %v484_v15  ;;  %v2952_v0 = vld [vmem:[#allocation36_spill] sm:$0xff] }
 0x1c0   :  { %v2587_v7 = vadd.f32 %v489_v1, %v2409_v16  ;;  %v2590_v44 = vadd.f32 %v490_v55, %v2411_v58  ;;  %v577_v45 = vpop.permute.xlu1 %576  ;;  %v2949_v16 = vld [vmem:[#allocation19_spill] sm:$0xff]  ;;  %v892_v2 = vpop.permute.xlu0 %891 }
 0x1c1   :  { %v581_v21 = vsel %vm580_vm12, %v577_v45, %v579_v40  ;;  %v582_v46 = vsel %vm580_vm12, %v579_v40, %v577_v45  ;;  %v573_v14 = vmul.f32 %v2948_v41, %v2949_v16  ;;  %v2953_v45 = vld [vmem:[#allocation17_spill] sm:$0xff]  ;;  %vm940_vm12 = vcmp.lt.s32.totalorder %v2289_v61, 109 }
 0x1c2   :  { %v587_v4 = vmul.f32 %v2946_v9, %v581_v21  ;;  %v588_v26 = vmul.f32 %v2946_v9, %v582_v46  ;;  %v987_v21 = vrot.slane %v982_v29, %v2953_v45  ;;  %v2954_v46 = vld [vmem:[#allocation16_spill] sm:$0xff] }
 0x1c3   :  { %v575_v10 = vadd.f32 %v573_v14, %v462_v50  ;;  %v991_v54 = vrot.slane %v982_v29, %v2954_v46 }
 0x1c4   :  { %v2600_v58 = vadd.f32 %v587_v4, %v2445_v11  ;;  %v2603_v40 = vadd.f32 %v588_v26, %v2447_v28  ;;  %v682_v35 = vpop.permute.xlu1 %681  ;;  %v2624_v43 = vpop.permute.xlu0 %944 }
 0x1c5   :  { %v686_v60 = vsel %vm685_vm13, %v682_v35, %v684_v33  ;;  %v687_v12 = vsel %vm685_vm13, %v684_v33, %v682_v35  ;;  %v997_v33 = vld [vmem:[#allocation8 + $0x10] ss:$8 sm:$0x3]  ;;  %vm850_vm13 = vcmp.lt.s32.totalorder %v2289_v61, 78 }
 0x1c6   :  { %v692_v37 = vmul.f32 %v2950_v20, %v686_v60  ;;  %v693_v48 = vmul.f32 %v2950_v20, %v687_v12  ;;  %v1002_v4 = vrot.slane %v997_v33, %v2953_v45  ;;  %v1006_v26 = vrot.slane %v997_v33, %v2954_v46  ;;  %v2958_v33 = vld [vmem:[#allocation45_spill] sm:$0xff] }
 0x1c8   :  { %v2609_v59 = vadd.f32 %v692_v37, %v574_v24  ;;  %v2611_v25 = vadd.f32 %v693_v48, %v575_v10  ;;  %v2613_v11 = vpop.permute.xlu1 %734 }
 0x1cc   :  { %v789_v28 = vpop.permute.xlu1 %788 }
 0x1cd   :  { %v791_v53 = vsel %vm790_vm14, %v787_v30, %v789_v28  ;;  %v792_v62 = vsel %vm790_vm14, %v789_v28, %v787_v30  ;;  %v2955_v30 = vld [vmem:[#allocation39_spill] sm:$0xff]  ;;  %vm955_vm14 = vcmp.lt.s32.totalorder %v2289_v61, 93 }
 0x1ce   :  { %v797_v49 = vmul.f32 %v2951_v63, %v792_v62  ;;  %v798_v36 = vmul.f32 %v2951_v63, %v791_v53  ;;  %v2956_v28 = vld [vmem:[#allocation43_spill] sm:$0xff] }
 0x1d0   :  { %v2619_v17 = vadd.f32 %v797_v49, %v2496_v5  ;;  %v2622_v47 = vadd.f32 %v798_v36, %v2498_v8  ;;  %v877_v27 = vpop.permute.xlu1 %876  ;;  %v592_v5 = vpop.permute.xlu0 %591 }
 0x1d4   :  { %v879_v15 = vpop.permute.xlu1 %878  ;;  %v697_v16 = vpop.permute.xlu0 %696 }
 0x1d5   :  { %v881_v51 = vsel %vm880_vm15, %v877_v27, %v879_v15  ;;  %v882_v32 = vsel %vm880_vm15, %v879_v15, %v877_v27  ;;  %v2957_v27 = vld [vmem:[#allocation41_spill] sm:$0xff]  ;;  %vm970_vm15 = vcmp.lt.s32.totalorder %v2289_v61, 77 }
 0x1d6   :  { %v887_v1 = vmul.f32 %v2952_v0, %v882_v32  ;;  %v888_v55 = vmul.f32 %v2952_v0, %v881_v51 }
 0x1d8   :  { %v889_v8 = vadd.f32 %v887_v1, %v2529_v13  ;;  %v890_v3 = vadd.f32 %v888_v55, %v2531_v39  ;;  %v894_v19 = vpop.permute.xlu1 %893 }
 0x1d9   :  { %v896_v50 = vsel %vm895_vm0, %v892_v2, %v894_v19  ;;  %v897_v9 = vsel %vm895_vm0, %v894_v19, %v892_v2  ;;  %vm1323_vm0 = vcmask 1040384  }
 0x1da   :  { %v902_v22 = vmul.f32 %v2955_v30, %v897_v9  ;;  %v903_v41 = vmul.f32 %v2955_v30, %v896_v50  ;;  %v994_v14 = vmul.f32 %v987_v21, %v889_v8  ;;  %v995_v35 = vmul.f32 %v991_v54, %v890_v3  ;;  %v2959_v54 = vld [vmem:[#allocation46_spill] sm:$0xff] }
 0x1dc   :  { %v904_v57 = vadd.f32 %v902_v22, %v2541_v31  ;;  %v905_v13 = vadd.f32 %v903_v41, %v2543_v56  ;;  %v494_v39 = vpop.permute.xlu1 %493  ;;  %v802_v31 = vpop.permute.xlu0 %801  ;;  %v1014_v22 = vld [vmem:[#allocation8 + $0x11] ss:$8 sm:$0x3] }
 0x1de   :  { %v1009_v60 = vmul.f32 %v1002_v4, %v904_v57  ;;  %v1010_v12 = vmul.f32 %v1006_v26, %v905_v13  ;;  %v1019_v13 = vrot.slane %v1014_v22, %v2953_v45 }
 0x1e0   :  { %v1011_v24 = vadd.f32 %v1009_v60, %v994_v14  ;;  %v1012_v10 = vadd.f32 %v1010_v12, %v995_v35  ;;  %v496_v20 = vpop.permute.xlu1 %495  ;;  %v2651_v1 = vpop.permute.xlu0 %854 }
 0x1e1   :  { %v498_v37 = vsel %vm497_vm1, %v494_v39, %v496_v20  ;;  %v499_v48 = vsel %vm497_vm1, %v496_v20, %v494_v39  ;;  %v1023_v39 = vrot.slane %v1014_v22, %v2954_v46  ;;  %vm1326_vm1 = vcmask 1041408  }
 0x1e2   :  { %v504_v2 = vmul.f32 %v2956_v28, %v498_v37  ;;  %v505_v53 = vmul.f32 %v2956_v28, %v499_v48 }
 0x1e4   :  { %v506_v56 = vadd.f32 %v504_v2, %v2572_v52  ;;  %v507_v62 = vadd.f32 %v505_v53, %v2574_v6  ;;  %v594_v63 = vpop.permute.xlu1 %593  ;;  %v2660_v9 = vpop.permute.xlu0 %959 }
 0x1e5   :  { %v596_v49 = vsel %vm595_vm2, %v592_v5, %v594_v63  ;;  %v597_v36 = vsel %vm595_vm2, %v594_v63, %v592_v5  ;;  %vm1329_vm2 = vcmask 1042432  }
 0x1e6   :  { %v602_v15 = vmul.f32 %v2957_v27, %v596_v49  ;;  %v603_v51 = vmul.f32 %v2957_v27, %v597_v36 }
 0x1e8   :  { %v604_v32 = vadd.f32 %v602_v15, %v2587_v7  ;;  %v605_v29 = vadd.f32 %v603_v51, %v2590_v44  ;;  %v699_v0 = vpop.permute.xlu1 %698  ;;  %v712_v41 = vpop.permute.xlu0 %711  ;;  %v2960_v15 = vld [vmem:[#allocation47_spill] sm:$0xff] }
 0x1e9   :  { %v701_v55 = vsel %vm700_vm3, %v697_v16, %v699_v0  ;;  %v702_v52 = vsel %vm700_vm3, %v699_v0, %v697_v16  ;;  %vm1332_vm3 = vcmask 1043456  }
 0x1ea   :  { %v707_v6 = vmul.f32 %v2958_v33, %v701_v55  ;;  %v708_v8 = vmul.f32 %v2958_v33, %v702_v52 }
 0x1ec   :  { %v709_v5 = vadd.f32 %v707_v6, %v2600_v58  ;;  %v710_v3 = vadd.f32 %v708_v8, %v2603_v40  ;;  %v804_v19 = vpop.permute.xlu1 %803  ;;  %v817_v20 = vpop.permute.xlu0 %816  ;;  %v1031_v6 = vld [vmem:[#allocation8 + $0x12] ss:$8 sm:$0x3] }
 0x1ed   :  { %v806_v21 = vsel %vm805_vm4, %v802_v31, %v804_v19  ;;  %v807_v7 = vsel %vm805_vm4, %v804_v19, %v802_v31  ;;  %vm1335_vm4 = vcmask 1044480  }
 0x1ee   :  { %v812_v44 = vmul.f32 %v2959_v54, %v806_v21  ;;  %v813_v50 = vmul.f32 %v2959_v54, %v807_v7 }
 0x1f0   :  { %v814_v4 = vadd.f32 %v812_v44, %v2609_v59  ;;  %v815_v26 = vadd.f32 %v813_v50, %v2611_v25  ;;  %v907_v30 = vpop.permute.xlu1 %906 }
 0x1f4   :  { %v909_v58 = vpop.permute.xlu1 %908 }
 0x1f5   :  { %v911_v40 = vsel %vm910_vm5, %v907_v30, %v909_v58  ;;  %v912_v57 = vsel %vm910_vm5, %v909_v58, %v907_v30  ;;  %vm1338_vm5 = vcmask 1045504  }
 0x1f6   :  { %v917_v16 = vmul.f32 %v2311_v23, %v912_v57  ;;  %v918_v14 = vmul.f32 %v2311_v23, %v911_v40 }
 0x1f8   :  { %v919_v59 = vadd.f32 %v917_v16, %v2619_v17  ;;  %v920_v25 = vadd.f32 %v918_v14, %v2622_v47  ;;  %v607_v35 = vpop.permute.xlu1 %606  ;;  %v922_v47 = vpop.permute.xlu0 %921 }
 0x1fa   :  { %v1026_v60 = vmul.f32 %v1019_v13, %v919_v59  ;;  %v1027_v12 = vmul.f32 %v1023_v39, %v920_v25 }
 0x1fc   :  { %v1028_v37 = vadd.f32 %v1026_v60, %v1011_v24  ;;  %v1029_v48 = vadd.f32 %v1027_v12, %v1012_v10  ;;  %v609_v28 = vpop.permute.xlu1 %608  ;;  %v2678_v52 = vpop.permute.xlu0 %974 }
 0x1fd   :  { %v611_v2 = vsel %vm610_vm6, %v607_v35, %v609_v28  ;;  %v612_v53 = vsel %vm610_vm6, %v609_v28, %v607_v35  ;;  %vm1341_vm6 = vcmask 1046528  }
 0x1fe   :  { %v617_v31 = vmul.f32 %v2325_v34, %v611_v2  ;;  %v618_v63 = vmul.f32 %v2325_v34, %v612_v53 }
 0x200   :  { %v619_v23 = vadd.f32 %v617_v31, %v506_v56  ;;  %v620_v17 = vadd.f32 %v618_v63, %v507_v62  ;;  %v714_v49 = vpop.permute.xlu1 %713  ;;  %v832_v30 = vpop.permute.xlu0 %831 }
 0x201   :  { %v716_v36 = vsel %vm715_vm7, %v712_v41, %v714_v49  ;;  %v717_v27 = vsel %vm715_vm7, %v714_v49, %v712_v41 }
 0x202   :  { %v722_v51 = vmul.f32 %v2960_v15, %v716_v36  ;;  %v723_v24 = vmul.f32 %v2960_v15, %v717_v27 }
 0x204   :  { %v724_v10 = vadd.f32 %v722_v51, %v604_v32  ;;  %v725_v0 = vadd.f32 %v723_v24, %v605_v29  ;;  %v819_v55 = vpop.permute.xlu1 %818  ;;  %v1036_v32 = vrot.slane %v1031_v6, %v2953_v45  ;;  %v1040_v29 = vrot.slane %v1031_v6, %v2954_v46  ;;  %v937_v13 = vpop.permute.xlu0 %936 }
 0x205   :  { %v821_v34 = vsel %vm820_vm8, %v817_v20, %v819_v55  ;;  %v822_v33 = vsel %vm820_vm8, %v819_v55, %v817_v20  ;;  %v1048_v20 = vld [vmem:[#allocation8 + $0x13] ss:$8 sm:$0x3]  ;;  %v1065_v55 = vld [vmem:[#allocation8 + $0x14] ss:$8 sm:$0x3] }
 0x206   :  { %v827_v56 = vmul.f32 %v2476_v42, %v821_v34  ;;  %v828_v62 = vmul.f32 %v2476_v42, %v822_v33  ;;  %v1057_v63 = vrot.slane %v1048_v20, %v2954_v46  ;;  %v1070_v6 = vrot.slane %v1065_v55, %v2953_v45 }
 0x208   :  { %v829_v8 = vadd.f32 %v827_v56, %v709_v5  ;;  %v830_v19 = vadd.f32 %v828_v62, %v710_v3  ;;  %v924_v21 = vpop.permute.xlu1 %923 }
 0x209   :  { %v926_v7 = vsel %vm925_vm9, %v922_v47, %v924_v21  ;;  %v927_v54 = vsel %vm925_vm9, %v924_v21, %v922_v47  ;;  %v1074_v21 = vrot.slane %v1065_v55, %v2954_v46 }
 0x20a   :  { %v932_v44 = vmul.f32 %v2545_v38, %v926_v7  ;;  %v933_v50 = vmul.f32 %v2545_v38, %v927_v54 }
 0x20c   :  { %v934_v22 = vadd.f32 %v932_v44, %v814_v4  ;;  %v935_v58 = vadd.f32 %v933_v50, %v815_v26  ;;  %v727_v42 = vpop.permute.xlu1 %726 }
 0x20e   :  { %v1043_v41 = vmul.f32 %v1036_v32, %v934_v22  ;;  %v1044_v40 = vmul.f32 %v1040_v29, %v935_v58 }
 0x210   :  { %v1045_v5 = vadd.f32 %v1043_v41, %v1028_v37  ;;  %v1046_v3 = vadd.f32 %v1044_v40, %v1029_v48  ;;  %v729_v57 = vpop.permute.xlu1 %728  ;;  %v847_v37 = vpop.permute.xlu0 %846 }
 0x211   :  { %v731_v39 = vsel %vm730_vm10, %v727_v42, %v729_v57  ;;  %v732_v16 = vsel %vm730_vm10, %v729_v57, %v727_v42 }
 0x212   :  { %v737_v14 = vmul.f32 %v2613_v11, %v731_v39  ;;  %v738_v59 = vmul.f32 %v2613_v11, %v732_v16  ;;  %v1053_v11 = vrot.slane %v1048_v20, %v2953_v45 }
 0x214   :  { %v739_v38 = vadd.f32 %v737_v14, %v619_v23  ;;  %v740_v4 = vadd.f32 %v738_v59, %v620_v17  ;;  %v834_v26 = vpop.permute.xlu1 %833  ;;  %v952_v36 = vpop.permute.xlu0 %951 }
 0x215   :  { %v836_v25 = vsel %vm835_vm11, %v832_v30, %v834_v26  ;;  %v837_v35 = vsel %vm835_vm11, %v834_v26, %v832_v30 }
 0x216   :  { %v842_v60 = vmul.f32 %v2607_v18, %v836_v25  ;;  %v843_v12 = vmul.f32 %v2607_v18, %v837_v35  ;;  %v2961_v25 = vld [vmem:[#allocation15_spill] sm:$0xff] }
 0x217   :  { %v2722_v35 = vsub.s32 2, %v2961_v25 }
 0x218   :  { %v844_v48 = vadd.f32 %v842_v60, %v724_v10  ;;  %v845_v28 = vadd.f32 %v843_v12, %v725_v0  ;;  %v939_v2 = vpop.permute.xlu1 %938  ;;  %v967_v32 = vpop.permute.xlu0 %966  ;;  %v2729_v12 = vld [vmem:[%s2854_s3] sm:$0xff]  ;;  %s1764_s3 = smov 124  }
 0x219   :  { %v941_v53 = vsel %vm940_vm12, %v937_v13, %v939_v2  ;;  %v942_v31 = vsel %vm940_vm12, %v939_v2, %v937_v13 }
 0x21a   :  { %v947_v23 = vmul.f32 %v2624_v43, %v941_v53  ;;  %v948_v17 = vmul.f32 %v2624_v43, %v942_v31 }
 0x21c   :  { %v949_v18 = vadd.f32 %v947_v23, %v829_v8  ;;  %v950_v47 = vadd.f32 %v948_v17, %v830_v19  ;;  %v849_v49 = vpop.permute.xlu1 %848  ;;  %v2752_v17 = vsub.s32 4, %v2961_v25 }
 0x21d   :  { %v851_v27 = vsel %vm850_vm13, %v847_v37, %v849_v49  ;;  %v852_v15 = vsel %vm850_vm13, %v849_v49, %v847_v37 }
 0x21e   :  { %v1060_v51 = vmul.f32 %v1053_v11, %v949_v18  ;;  %v1061_v24 = vmul.f32 %v1057_v63, %v950_v47  ;;  %v857_v10 = vmul.f32 %v2651_v1, %v851_v27  ;;  %v858_v0 = vmul.f32 %v2651_v1, %v852_v15  ;;  %v1082_v1 = vld [vmem:[#allocation8 + $0x15] ss:$8 sm:$0x3] }
 0x21f   :  { %v1087_v30 = vrot.slane %v1082_v1, %v2953_v45  ;;  %v1091_v22 = vrot.slane %v1082_v1, %v2954_v46  ;;  %v2741_v11 = vsub.s32 3, %v2961_v25  ;;  %v2763_v27 = vsub.s32 5, %v2961_v25  ;;  %v2804_v1 = vld [vmem:[#allocation2 + $0x8] sm:$0xff] }
 0x220   :  { %v1062_v34 = vadd.f32 %v1060_v51, %v1045_v5  ;;  %v1063_v33 = vadd.f32 %v1061_v24, %v1046_v3  ;;  %v859_v43 = vadd.f32 %v857_v10, %v739_v38  ;;  %v860_v56 = vadd.f32 %v858_v0, %v740_v4  ;;  %v954_v62 = vpop.permute.xlu1 %953 }
 0x221   :  { %v956_v8 = vsel %vm955_vm14, %v952_v36, %v954_v62  ;;  %v957_v19 = vsel %vm955_vm14, %v954_v62, %v952_v36  ;;  %v2774_v0 = vsub.s32 6, %v2961_v25 }
 0x222   :  { %v962_v7 = vmul.f32 %v2660_v9, %v956_v8  ;;  %v963_v54 = vmul.f32 %v2660_v9, %v957_v19 }
 0x224   :  { %v964_v29 = vadd.f32 %v962_v7, %v844_v48  ;;  %v965_v44 = vadd.f32 %v963_v54, %v845_v28  ;;  %v969_v50 = vpop.permute.xlu1 %968 }
 0x225   :  { %v971_v58 = vsel %vm970_vm15, %v967_v32, %v969_v50  ;;  %v972_v42 = vsel %vm970_vm15, %v969_v50, %v967_v32 }
 0x226   :  { %v1077_v41 = vmul.f32 %v1070_v6, %v964_v29  ;;  %v1078_v40 = vmul.f32 %v1074_v21, %v965_v44  ;;  %v977_v5 = vmul.f32 %v2678_v52, %v971_v58  ;;  %v978_v3 = vmul.f32 %v2678_v52, %v972_v42  ;;  %v2806_v29 = vld [vmem:[#allocation2] sm:$0xff] }
 0x227   :  { %v72_v44 = vadd.f32 %v2806_v29, %v2804_v1 }
 0x228   :  { %v1079_v9 = vadd.f32 %v1077_v41, %v1062_v34  ;;  %v1080_v57 = vadd.f32 %v1078_v40, %v1063_v33  ;;  %v979_v13 = vadd.f32 %v977_v5, %v859_v43  ;;  %v980_v61 = vadd.f32 %v978_v3, %v860_v56 }
 0x229   :  { %v2785_v56 = vsub.s32 7, %v2961_v25 }
 0x22a   :  { %v1094_v39 = vmul.f32 %v1087_v30, %v979_v13  ;;  %v1095_v16 = vmul.f32 %v1091_v22, %v980_v61 }
 0x22c   :  { %v2711_v14 = vadd.f32 %v1094_v39, %v1079_v9  ;;  %v2713_v59 = vadd.f32 %v1095_v16, %v1080_v57 }
 0x22e   :  { %v1098_v38 = vadd.f32 %v2713_v59, %v2711_v14  ;;  %v1101_v4 = vmul.f32 %v2711_v14, %v2711_v14  ;;  %v1102_v26 = vmul.f32 %v2713_v59, %v2713_v59 }
 0x230   :  { %1099 = vadd.xlane.f32.xlu0 %v1098_v38  ;;  %v1103_v52 = vadd.f32 %v1102_v26, %v1101_v4 }
 0x232   :  { %1104 = vadd.xlane.f32.xlu1 %v1103_v52 }
 0x2bd   :  { %v2724_v60 = vpop.xlane.xlu0 %1099 }
 0x2be   :  { %v1122_v20 = vrot.slane %v2724_v60, %v2954_v46  ;;  %v1142_v2 = vrot.slane %v2724_v60, %v2722_v35  ;;  %v1162_v23 = vrot.slane %v2724_v60, %v2741_v11  ;;  %v1182_v36 = vrot.slane %v2724_v60, %v2752_v17 }
 0x2bf   :  { %v2733_v37 = vpop.xlane.xlu1 %1104  ;;  %v1202_v10 = vrot.slane %v2724_v60, %v2763_v27  ;;  %v1222_v43 = vrot.slane %v2724_v60, %v2774_v0  ;;  %v1242_v19 = vrot.slane %v2724_v60, %v2785_v56  ;;  %v1110_v42 = vrot.slane %v2724_v60, %v2953_v45 }
 0x2c0   :  { %v1123_v48 = vmul.f32 %v1122_v20, %v2729_v12  ;;  %v1132_v28 = vrot.slane %v2733_v37, %v2954_v46  ;;  %v1152_v31 = vrot.slane %v2733_v37, %v2722_v35  ;;  %v1143_v63 = vmul.f32 %v1142_v2, %v2729_v12 }
 0x2c1   :  { %v1172_v47 = vrot.slane %v2733_v37, %v2741_v11  ;;  %v1163_v49 = vmul.f32 %v1162_v23, %v2729_v12  ;;  %v1192_v51 = vrot.slane %v2733_v37, %v2752_v17  ;;  %v1183_v24 = vmul.f32 %v1182_v36, %v2729_v12 }
 0x2c2   :  { %1125 = vrot.lane.b32.xlu0 %v1123_v48, %s1736_s13  ;;  %v1133_v53 = vmul.f32 %v1132_v28, %v2729_v12  ;;  %v1153_v18 = vmul.f32 %v1152_v31, %v2729_v12  ;;  %v1212_v34 = vrot.slane %v2733_v37, %v2763_v27  ;;  %v1203_v33 = vmul.f32 %v1202_v10, %v2729_v12 }
 0x2c3   :  { %v1173_v15 = vmul.f32 %v1172_v47, %v2729_v12  ;;  %v1193_v55 = vmul.f32 %v1192_v51, %v2729_v12  ;;  %v1232_v6 = vrot.slane %v2733_v37, %v2774_v0  ;;  %v1223_v8 = vmul.f32 %v1222_v43, %v2729_v12  ;;  %v76_v43 = vld [vmem:[#allocation7] sm:$0xff] }
 0x2c4   :  { %1135 = vrot.lane.b32.xlu1 %v1133_v53, %s1736_s13  ;;  %v1213_v62 = vmul.f32 %v1212_v34, %v2729_v12  ;;  %v1252_v7 = vrot.slane %v2733_v37, %v2785_v56  ;;  %v1243_v54 = vmul.f32 %v1242_v19, %v2729_v12  ;;  %v1116_v40 = vrot.slane %v2733_v37, %v2953_v45 }
 0x2c5   :  { %v1233_v21 = vmul.f32 %v1232_v6, %v2729_v12  ;;  %v1111_v3 = vmul.f32 %v1110_v42, %v2729_v12  ;;  %v1768_v51 = vmov 49  }
 0x2c6   :  { %1145 = vrot.lane.b32.xlu0 %v1143_v63, %s1745_s16  ;;  %v1253_v32 = vmul.f32 %v1252_v7, %v2729_v12  ;;  %v1117_v13 = vmul.f32 %v1116_v40, %v2729_v12  ;;  %1524 = vset.pattern.permute.xlu1 %v1768_v51 }
 0x2c8   :  { %1155 = vrot.lane.b32.xlu1 %v1153_v18, %s1745_s16 }
 0x2ca   :  { %1165 = vrot.lane.b32.xlu0 %v1163_v49, %s1752_s22 }
 0x2cc   :  { %1175 = vrot.lane.b32.xlu1 %v1173_v15, %s1752_s22 }
 0x2ce   :  { %1185 = vrot.lane.b32.xlu0 %v1183_v24, %s1764_s3 }
 0x2d0   :  { %1195 = vrot.lane.b32.xlu1 %v1193_v55, %s1764_s3 }
 0x2d2   :  { %1205 = vrot.lane.b32.xlu0 %v1203_v33, %s1765_s9 }
 0x2d4   :  { %1215 = vrot.lane.b32.xlu1 %v1213_v62, %s1765_s9 }
 0x2d6   :  { %1225 = vrot.lane.b32.xlu0 %v1223_v8, %s1766_s10 }
 0x2d8   :  { %1235 = vrot.lane.b32.xlu1 %v1233_v21, %s1766_s10  ;;  %v1543_v21 = vld [vmem:[#allocation5] sm:$0xff] }
 0x2da   :  { %1245 = vrot.lane.b32.xlu0 %v1243_v54, %s1767_s11 }
 0x2dc   :  { %1255 = vrot.lane.b32.xlu1 %v1253_v32, %s1767_s11 }
 0x300   :  { %73 = vadd.xlane.f32.xlu1 %v72_v44 }
 0x334   :  { %v1126_v50 = vpop.permute.xlu0 %1125 }
 0x335   :  { %v1128_v57 = vadd.f32 %v1126_v50, %v1111_v3 }
 0x336   :  { %v1136_v30 = vpop.permute.xlu1 %1135 }
 0x337   :  { %v1138_v39 = vadd.f32 %v1136_v30, %v1117_v13 }
 0x338   :  { %v1146_v22 = vpop.permute.xlu0 %1145 }
 0x339   :  { %v1148_v16 = vadd.f32 %v1146_v22, %v1128_v57 }
 0x33a   :  { %v1156_v58 = vpop.permute.xlu1 %1155 }
 0x33b   :  { %v1158_v4 = vadd.f32 %v1156_v58, %v1138_v39 }
 0x33c   :  { %v1166_v41 = vpop.permute.xlu0 %1165 }
 0x33d   :  { %v1168_v26 = vadd.f32 %v1166_v41, %v1148_v16 }
 0x33e   :  { %v1176_v5 = vpop.permute.xlu1 %1175 }
 0x33f   :  { %v1178_v25 = vadd.f32 %v1176_v5, %v1158_v4 }
 0x340   :  { %v1186_v9 = vpop.permute.xlu0 %1185 }
 0x341   :  { %v1188_v60 = vadd.f32 %v1186_v9, %v1168_v26 }
 0x342   :  { %v1196_v61 = vpop.permute.xlu1 %1195 }
 0x343   :  { %v1198_v48 = vadd.f32 %v1196_v61, %v1178_v25 }
 0x344   :  { %v1206_v38 = vpop.permute.xlu0 %1205 }
 0x345   :  { %v1208_v28 = vadd.f32 %v1206_v38, %v1188_v60  ;;  %v2962_v60 = vmov 0  }
 0x346   :  { %v1216_v52 = vpop.permute.xlu1 %1215 }
 0x347   :  { %v1218_v2 = vadd.f32 %v1216_v52, %v1198_v48 }
 0x348   :  { %v1226_v20 = vpop.permute.xlu0 %1225 }
 0x349   :  { %v1228_v53 = vadd.f32 %v1226_v20, %v1208_v28 }
 0x34a   :  { %v1236_v37 = vpop.permute.xlu1 %1235 }
 0x34b   :  { %v1238_v63 = vadd.f32 %v1236_v37, %v1218_v2 }
 0x34c   :  { %v1246_v31 = vpop.permute.xlu0 %1245 }
 0x34d   :  { %v1248_v23 = vadd.f32 %v1246_v31, %v1228_v53 }
 0x34e   :  { %v1256_v18 = vpop.permute.xlu1 %1255 }
 0x34f   :  { %v1259_v12 = vmul.f32 %v1248_v23, %v1248_v23  ;;  %v1258_v47 = vadd.f32 %v1256_v18, %v1238_v63 }
 0x351   :  { %v1260_v49 = vsub.f32 %v1258_v47, %v1259_v12 }
 0x353   :  { %v1261_v36 = vmax.f32 %v1260_v49, 0.0 }
 0x355   :  { %v1262_v15 = vadd.f32 1e-05, %v1261_v36 }
 0x357   :  { %1527 = vrsqrt.f32 %v1262_v15 }
 0x361   :  { %v1528_v24 = vpop.eup %1527 }
 0x362   :  { %1265 = vrot.lane.b32.xlu0 %v1528_v24, %s1702_s23 }
 0x38d   :  { %v74_v10 = vpop.xlane.xlu1 %73 }
 0x38e   :  { %v75_v55 = vmul.f32 0.00390625, %v74_v10 }
 0x390   :  { %v80_v34 = vrot.slane %v75_v55, %v2953_v45  ;;  %v146_v33 = vrot.slane %v75_v55, %v2785_v56  ;;  %v86_v8 = vrot.slane %v75_v55, %v2954_v46  ;;  %v96_v32 = vrot.slane %v75_v55, %v2722_v35 }
 0x391   :  { %v106_v45 = vrot.slane %v75_v55, %v2741_v11  ;;  %v116_v50 = vrot.slane %v75_v55, %v2752_v17  ;;  %v126_v30 = vrot.slane %v75_v55, %v2763_v27  ;;  %v136_v35 = vrot.slane %v75_v55, %v2774_v0 }
 0x392   :  { %v81_v62 = vmul.f32 %v80_v34, %v76_v43  ;;  %v147_v6 = vmul.f32 %v146_v33, %v76_v43  ;;  %v87_v54 = vmul.f32 %v86_v8, %v76_v43  ;;  %v97_v44 = vmul.f32 %v96_v32, %v76_v43 }
 0x393   :  { %v107_v56 = vmul.f32 %v106_v45, %v76_v43  ;;  %v117_v46 = vmul.f32 %v116_v50, %v76_v43  ;;  %v127_v22 = vmul.f32 %v126_v30, %v76_v43  ;;  %v137_v58 = vmul.f32 %v136_v35, %v76_v43 }
 0x394   :  { %v1769_v11 = vmov 50  }
 0x395   :  { %1525 = vset.pattern.permute.xlu0 %v1769_v11 }
 0x3d4   :  { %v1266_v19 = vpop.permute.xlu0 %1265 }
 0x3d5   :  { %v1268_v7 = vmul.f32 %v1543_v21, %v1266_v19 }
 0x3d7   :  { %1270 = vrot.lane.b32.xlu0 %v1268_v7, %s1763_s6  ;;  %1280 = vperm.xlu1 %1524, %v1268_v7  }
 0x3db   :  { %89 = vrot.lane.b32.xlu0 %v87_v54, %s1736_s13 }
 0x3df   :  { %99 = vrot.lane.b32.xlu0 %v97_v44, %s1745_s16 }
 0x3e3   :  { %109 = vrot.lane.b32.xlu0 %v107_v56, %s1752_s22 }
 0x3e7   :  { %119 = vrot.lane.b32.xlu0 %v117_v46, %s1764_s3 }
 0x3eb   :  { %129 = vrot.lane.b32.xlu0 %v127_v22, %s1765_s9 }
 0x3ef   :  { %139 = vrot.lane.b32.xlu0 %v137_v58, %s1766_s10 }
 0x449   :  { %v1271_v42 = vpop.permute.xlu0 %1270 }
 0x44a   :  { %v1273_v41 = vmul.f32 %v1271_v42, %v1248_v23 }
 0x44c   :  { %1275 = vrot.lane.b32.xlu0 %v1273_v41, %s1683_s15  ;;  %s1770_s15 = smov [#allocation10]  }
 0x44d   :  { %v90_v17 = vpop.permute.xlu0 %89  ;;  %s1352_s23 = sshll.u32 %s1770_s15, 4  ;;  %s1353_s23 = int_to_ptr.vmem [resolvable:$true] %s1352_s23 }
 0x44e   :  { %v92_v9 = vadd.f32 %v90_v17, %v81_v62  ;;  %s1632_s2 = scalar_lea.vmem %s1353_s23, 256  ;;  %p1637_p5 = scmp.lt.s32.totalorder %s1353_s23, %s1353_s23 }
 0x44f   :  { %p1633_p4 = scmp.ne.s32.totalorder %s1353_s23, %s1632_s2  ;;  %p1638_p6 = scmp.lt.s32.totalorder %s1632_s2, %s1632_s2 }
 0x450   :  { %149 = vrot.lane.b32.xlu0 %v147_v6, %s1767_s11 }
 0x451   :  { %v100_v27 = vpop.permute.xlu0 %99  ;;  %p1639_p7 = por %p1638_p6, %p1637_p5 }
 0x452   :  { %v102_v0 = vadd.f32 %v100_v27, %v92_v9 }
 0x453   :  { %p1640_p8 = pnand %p1639_p7, %p1633_p4 }
 0x455   :  { %v110_v40 = vpop.permute.xlu0 %109 }
 0x456   :  { %v112_v13 = vadd.f32 %v110_v40, %v102_v0  ;;  %v1281_v37 = vpop.permute.xlu1 %1280 }
 0x457   :  { %v1283_v2 = vmul.f32 %v1281_v37, %v2711_v14  ;;  %v1284_v53 = vmul.f32 %v1281_v37, %v2713_v59 }
 0x459   :  { %v120_v5 = vpop.permute.xlu0 %119 }
 0x45a   :  { %v122_v61 = vadd.f32 %v120_v5, %v112_v13 }
 0x45d   :  { %v130_v3 = vpop.permute.xlu0 %129 }
 0x45e   :  { %v132_v16 = vadd.f32 %v130_v3, %v122_v61 }
 0x461   :  { %v140_v57 = vpop.permute.xlu0 %139 }
 0x462   :  { %v142_v4 = vadd.f32 %v140_v57, %v132_v16 }
 0x4be   :  { %v1276_v39 = vpop.permute.xlu0 %1275 }
 0x4bf   :  { %v1278_v38 = vsub.f32 %v1543_v21, %v1276_v39 }
 0x4c1   :  { %1287 = vperm.xlu0 %1525, %v1278_v38  }
 0x4c2   :  { %v150_v26 = vpop.permute.xlu0 %149 }
 0x4c3   :  { %v152_v52 = vadd.f32 %v150_v26, %v142_v4 }
 0x4c5   :  { %v1363_v25 = vmul.f32 -1.442695, %v152_v52  ;;  %1526 = vset.pattern.permute.xlu0 %v2962_v60 }
 0x4c7   :  { %1529 = vpow2.f32 %v1363_v25 }
 0x4d1   :  { %v1530_v20 = vpop.eup %1529 }
 0x4d2   :  { %v156_v48 = vadd.f32 1.0, %v1530_v20 }
 0x4d4   :  { %1531 = vrcp.f32 %v156_v48 }
 0x4de   :  { %v1532_v28 = vpop.eup %1531 }
 0x4df   :  { %1308 = vperm.xlu0 %1526, %v1532_v28  }
 0x540   :  { %v1288_v31 = vpop.permute.xlu0 %1287 }
 0x541   :  { %v1290_v63 = vadd.f32 %v1288_v31, %v1283_v2  ;;  %v1291_v23 = vadd.f32 %v1288_v31, %v1284_v53 }
 0x543   :  { %v1364_v18 = vmul.f32 -1.442695, %v1290_v63  ;;  %v1365_v12 = vmul.f32 -1.442695, %v1291_v23 }
 0x545   :  { %1533 = vpow2.f32 %v1364_v18 }
 0x546   :  { %1535 = vpow2.f32 %v1365_v12 }
 0x54f   :  { %v1534_v47 = vpop.eup %1533 }
 0x550   :  { %v1536_v49 = vpop.eup %1535  ;;  %v1298_v36 = vadd.f32 1.0, %v1534_v47 }
 0x551   :  { %v1299_v15 = vadd.f32 1.0, %v1536_v49 }
 0x552   :  { %1537 = vrcp.f32 %v1298_v36 }
 0x553   :  { %1539 = vrcp.f32 %v1299_v15 }
 0x55c   :  { %v1538_v51 = vpop.eup %1537 }
 0x55d   :  { %v1540_v24 = vpop.eup %1539  ;;  %v1304_v10 = vmul.f32 %v2806_v29, %v1538_v51 }
 0x55e   :  { %v1309_v14 = vpop.permute.xlu0 %1308  ;;  %v1305_v59 = vmul.f32 %v2804_v1, %v1540_v24 }
 0x55f   :  { %v1311_v55 = vmul.f32 %v1309_v14, %v1304_v10 }
 0x560   :  { %v1312_v34 = vmul.f32 %v1309_v14, %v1305_v59 }
 0x561   :  { %v1315_v33 = vrot.slane %v1311_v55, 1  ;;  %v1319_v43 = vrot.slane %v1311_v55, 7 }
 0x562   :  { %v1316_v62 = vrot.slane %v1312_v34, 1  ;;  %v1320_v6 = vrot.slane %v1312_v34, 7 }
 0x563   :  { %v1324_v8 = vsel %vm1323_vm0, %v1311_v55, %v1315_v33 }
 0x564   :  { %v1325_v19 = vsel %vm1323_vm0, %v1312_v34, %v1316_v62  ;;  %v1327_v21 = vsel %vm1326_vm1, %v1324_v8, %v1319_v43 }
 0x565   :  { %v1328_v7 = vsel %vm1326_vm1, %v1325_v19, %v1320_v6  ;;  %v1330_v54 = vsel %vm1329_vm2, %v1327_v21, %v1311_v55 }
 0x566   :  { %v1331_v29 = vsel %vm1329_vm2, %v1328_v7, %v1312_v34  ;;  %v1333_v32 = vsel %vm1332_vm3, %v1330_v54, %v1311_v55 }
 0x567   :  { %v1334_v1 = vsel %vm1332_vm3, %v1331_v29, %v1312_v34  ;;  %v1336_v44 = vsel %vm1335_vm4, %v1333_v32, %v1315_v33 }
 0x568   :  { %v1337_v45 = vsel %vm1335_vm4, %v1334_v1, %v1316_v62  ;;  %v1339_v56 = vsel %vm1338_vm5, %v1336_v44, %v1319_v43 }
 0x569   :  { %v1340_v50 = vsel %vm1338_vm5, %v1337_v45, %v1320_v6  ;;  %v1342_v46 = vsel %vm1341_vm6, %v1339_v56, %v1311_v55 }
 0x56a   :  { %v1343_v30 = vsel %vm1341_vm6, %v1340_v50, %v1312_v34  ;;  %1344 = vst [vmem:[#allocation10] sm:$0xff] %v1342_v46 }
 0x56b   :  { %1345 = vst [vmem:[#allocation10 + $0x8] sm:$0xff] %v1343_v30 }
 0x56c   :  { %1643 = shalt.err (!%p1640_p8)
}
 0x56d   :  { %s1644_s14 = scalar_lea.hbm %s2856_s5, 256 }
 0x56e   :  { %p1645_p9 = scmp.ne.s32.totalorder %s2856_s5, %s1644_s14  ;;  %p1648_p10 = scmp.lt.u32.totalorder %s1644_s14, %s2856_s5 }
 0x570   :  { %p1650_p11 = pnand %p1648_p10, %p1645_p9 }
 0x572   :  { %1653 = shalt.err (!%p1650_p11)
}
 0x573   :  { %1355 = dma.vmem_to_hbm [thread:$0]  %s1353_s23, 256, %s2856_s5, [#allocation4]  }
 0x574   :  { %1660 = dma.done.wait [#allocation4], 256  }
 0x575   :  { %1661 = vsyncadd [#allocation4], 4294967040 }
 0x576   :  { %1359 = vsyncpa [#allocation3], 1 }
 0x577   :  { %1360 = vsyncpa [#allocation6], 1 }
 0x578   :  { %1361 = vsyncpa [#allocation9], 1 }
 0x579   :  { %1362 = vsyncpa [#allocation4], 1 }

</bundles_post_ra>
